<compile_context>
chip_gen: v5e
topology: v5e:2x2
jax: 0.10.0
libtpu: 0.0.40
codegen_flags: <defaults>
</compile_context>

<pallas_src>
import functools

import jax
import jax.numpy as jnp
from jax import lax
from jax.experimental import pallas as pl
from jax.experimental.pallas import tpu as pltpu

NEG_SLOPE = 0.01  # F.leaky_relu default


def _round_up(n, m):
    return ((n + m - 1) // m) * m


def _default_carry_dtype():
    """bf16 activation carry on chips with a bf16 VALU (v6e/v7x); f32 otherwise."""
    try:
        kind = jax.devices()[0].device_kind.lower()
    except Exception:
        return jnp.float32
    if any(t in kind for t in ("v2", "v3", "v4", "v5")):
        return jnp.float32
    return jnp.bfloat16


def _residual_net_kernel(num_final_fcs, x_ref, w0_ref, b0_ref, wr_ref, br_ref, out_ref):
    carry_dtype = b0_ref.dtype

    # input2hid: MXU matmul (bf16 in, f32 acc); bias + leaky-relu in the carry dtype.
    h = jnp.dot(x_ref[...], w0_ref[...], preferred_element_type=jnp.float32)
    h = h.astype(carry_dtype) + b0_ref[...]
    hidden = jnp.maximum(h, NEG_SLOPE * h)            # leaky_relu via max (2 VALU ops)

    def layer(i, hidden):
        # bf16 matmul operands, f32 MXU accumulation; bias/relu/add in carry dtype.
        acc = jnp.dot(hidden.astype(jnp.bfloat16), wr_ref[i],
                      preferred_element_type=jnp.float32)
        residual = jnp.maximum(acc.astype(carry_dtype) + br_ref[i], 0)   # relu
        return hidden + residual, residual

    # Peel layer 0 (seeds the carry; avoids a dead zeros init).
    hidden, residual = layer(0, hidden)

    def body(i, carry):
        hidden, _ = carry
        return layer(i, hidden)

    # Small static trip count: fully unroll so the scheduler can overlap MXU pushes
    # of layer i with the VALU epilogue of layer i-1.
    _, residual = lax.fori_loop(1, num_final_fcs, body, (hidden, residual),
                                unroll=True)

    out_ref[...] = residual.astype(out_ref.dtype)


def residual_net(x, w0, b0, wr, br, *, tb_max=4096, carry_dtype=None,
                 out_dtype=jnp.float32):
    """x: [B, IN]; w0: [IN, H]; b0: [1, H]; wr: [L, H, H]; br: [L, 1, H] -> [B, H]."""
    B, IN = x.shape
    H = w0.shape[1]
    L = wr.shape[0]
    if L == 0:
        # Matches the previous reference behaviour (last-residual undefined in torch).
        return jnp.zeros((B, H), out_dtype)

    if carry_dtype is None:
        carry_dtype = _default_carry_dtype()

    # Batch tile: multiple of 8 (sublane constraint).  VMEM is not the limiter; a big
    # tile just amortizes per-grid-step overhead and lengthens MXU streams.
    tb_max = max(8, (int(tb_max) // 8) * 8)
    TB = min(tb_max, _round_up(B, 8))
    # Keep >= 2 grid steps when the batch allows, so the software pipeline (and a
    # second TensorCore on v7x) always has work.
    if TB >= B and B >= 16:
        TB = _round_up(pl.cdiv(B, 2), 8)
    Bp = _round_up(B, TB)
    if Bp != B:
        x = jnp.pad(x, ((0, Bp - B), (0, 0)))

    # bf16 matmul operands (halves weight/activation traffic, feeds the MXU natively);
    # biases in the carry dtype so the per-layer elementwise work stays in that dtype.
    x_bf = x.astype(jnp.bfloat16)
    w0_bf = w0.astype(jnp.bfloat16)
    wr_bf = wr.astype(jnp.bfloat16)
    b0_c = b0.astype(carry_dtype)
    br_c = br.astype(carry_dtype)

    grid = (Bp // TB,)
    out_itemsize = jnp.dtype(out_dtype).itemsize

    flops = 2 * Bp * (IN * H + L * H * H)
    bytes_accessed = (x_bf.size * 2 + w0_bf.size * 2 + wr_bf.size * 2
                      + b0_c.nbytes + br_c.nbytes + Bp * H * out_itemsize)

    # Explicit scoped-VMEM limit: double-buffered x/out tiles + resident weights,
    # with generous headroom.  Keeps large TB safe under v5e's 16 MiB default and
    # well inside v7x's 64 MiB physical VMEM.
    vmem_need = (2 * TB * H * out_itemsize           # out tile, double-buffered
                 + 2 * TB * IN * 2                   # x tile (bf16), double-buffered
                 + (IN * H + L * H * H) * 2          # resident bf16 weights
                 + b0_c.nbytes + br_c.nbytes)
    vmem_limit = int(min(64 * 2 ** 20, max(16 * 2 ** 20, 2 * vmem_need)))

    kernel = functools.partial(_residual_net_kernel, L)
    out = pl.pallas_call(
        kernel,
        out_shape=jax.ShapeDtypeStruct((Bp, H), out_dtype),
        grid_spec=pltpu.PrefetchScalarGridSpec(
            num_scalar_prefetch=0,
            grid=grid,
            in_specs=[
                pl.BlockSpec((TB, IN), lambda i: (i, 0)),        # x: streamed per tile
                pl.BlockSpec((IN, H), lambda i: (0, 0)),         # w0: VMEM-resident
                pl.BlockSpec((1, H), lambda i: (0, 0)),          # b0: VMEM-resident
                pl.BlockSpec((L, H, H), lambda i: (0, 0, 0)),    # wr: VMEM-resident
                pl.BlockSpec((L, 1, H), lambda i: (0, 0, 0)),    # br: VMEM-resident
            ],
            out_specs=pl.BlockSpec((TB, H), lambda i: (i, 0)),
        ),
        compiler_params=pltpu.CompilerParams(
            dimension_semantics=("parallel",),   # batch axis
            vmem_limit_bytes=vmem_limit,
        ),
        cost_estimate=pl.CostEstimate(
            flops=flops, transcendentals=0, bytes_accessed=bytes_accessed),
    )(x_bf, w0_bf, b0_c, wr_bf, br_c)

    return out[:B] if Bp != B else out


def reference_matched(x, w0, b0, wr, br, carry_dtype):
    """Pure-JAX reference with the SAME precision choices as the kernel.

    Note: numerics intentionally diverge from the f32 PyTorch reference (bf16 matmul
    operands, and a bf16 activation carry on v6e/v7x); expect ~1e-3 (f32 carry) to
    ~1e-2 (bf16 carry) absolute error vs. full-f32 math.
    """
    x_bf = x.astype(jnp.bfloat16)
    w0_bf = w0.astype(jnp.bfloat16)
    wr_bf = wr.astype(jnp.bfloat16)
    h = jnp.dot(x_bf, w0_bf, preferred_element_type=jnp.float32)
    h = h.astype(carry_dtype) + b0.astype(carry_dtype)
    hidden = jnp.maximum(h, NEG_SLOPE * h)
    residual = jnp.zeros_like(hidden)
    for i in range(wr.shape[0]):
        acc = jnp.dot(hidden.astype(jnp.bfloat16), wr_bf[i],
                      preferred_element_type=jnp.float32)
        residual = jnp.maximum(acc.astype(carry_dtype) + br[i].astype(carry_dtype), 0)
        hidden = hidden + residual
    return residual.astype(jnp.float32)


if __name__ == "__main__":
    # Shapes consistent with the module: hidden_size=128, num_final_fcs=4.
    # B=256 exercises a 2-step pipelined batch grid with the default tiling logic.
    B, IN, H, L = 256, 32, 128, 4

    key = jax.random.PRNGKey(0)
    k_x, k_w0, k_b0, k_wr, k_br = jax.random.split(key, 5)

    x = jax.random.normal(k_x, (B, IN), dtype=jnp.float32)
    w0 = jax.random.uniform(k_w0, (IN, H), jnp.float32, -1.0, 1.0) / jnp.sqrt(IN)
    b0 = jax.random.uniform(k_b0, (1, H), jnp.float32, -1.0, 1.0) / jnp.sqrt(IN)
    wr = jax.random.uniform(k_wr, (L, H, H), jnp.float32, -1.0, 1.0) / jnp.sqrt(H)
    br = jax.random.uniform(k_br, (L, 1, H), jnp.float32, -1.0, 1.0) / jnp.sqrt(H)

    carry_dtype = _default_carry_dtype()
    out = residual_net(x, w0, b0, wr, br)
    jax.block_until_ready(out)

    ref = reference_matched(x, w0, b0, wr, br, carry_dtype)
    tol = 2e-2 if carry_dtype == jnp.bfloat16 else 2e-3
    assert out.shape == (B, H)
    assert out.dtype == jnp.float32
    assert jnp.allclose(out.astype(jnp.float32), ref, atol=tol, rtol=tol), \
        f"max abs err {jnp.max(jnp.abs(out.astype(jnp.float32) - ref))}"

    print("KERNEL_OK")
</pallas_src>

<mosaic_0001>
module attributes {stable_mosaic.version = 11 : i64} {
  func.func @_residual_net_kernel(%arg0: i32, %arg1: memref<128x32xbf16, #tpu.memory_space<vmem>>, %arg2: memref<32x128xbf16, #tpu.memory_space<vmem>>, %arg3: memref<1x128xbf16, #tpu.memory_space<vmem>>, %arg4: memref<4x128x128xbf16, #tpu.memory_space<vmem>>, %arg5: memref<4x1x128xbf16, #tpu.memory_space<vmem>>, %arg6: memref<128x128xf32, #tpu.memory_space<vmem>>) attributes {dimension_semantics = [#tpu.dimension_semantics<parallel>], iteration_bounds = array<i64: 2>, scalar_prefetch = 0 : i64, scratch_operands = 0 : i64, tpu.core_type = #tpu.core_type<tc>, window_params = [{transform_indices = @transform_0, window_bounds = array<i64: 128, 32>}, {pipeline_mode = #tpu.pipeline_mode<synchronous>, transform_indices = @transform_1, window_bounds = array<i64: 32, 128>}, {pipeline_mode = #tpu.pipeline_mode<synchronous>, transform_indices = @transform_2, window_bounds = array<i64: 1, 128>}, {pipeline_mode = #tpu.pipeline_mode<synchronous>, transform_indices = @transform_3, window_bounds = array<i64: 4, 128, 128>}, {pipeline_mode = #tpu.pipeline_mode<synchronous>, transform_indices = @transform_4, window_bounds = array<i64: 4, 1, 128>}, {transform_indices = @transform_5, window_bounds = array<i64: 128, 128>}]} {
    %c0 = arith.constant 0 : index
    %c0_0 = arith.constant 0 : index
    %0 = vector.load %arg1[%c0, %c0_0] : memref<128x32xbf16, #tpu.memory_space<vmem>>, vector<128x32xbf16>
    %c0_1 = arith.constant 0 : index
    %c0_2 = arith.constant 0 : index
    %1 = vector.load %arg2[%c0_1, %c0_2] : memref<32x128xbf16, #tpu.memory_space<vmem>>, vector<32x128xbf16>
    %cst = arith.constant dense<0.000000e+00> : vector<128x128xf32>
    %2 = tpu.matmul %0, %1, %cst {dimension_numbers = #tpu.dot_dimension_numbers<[1], [0], [0], [1], [0, 0, 1, 1], [], []>} : vector<128x32xbf16>, vector<32x128xbf16>, vector<128x128xf32> -> vector<128x128xf32>
    %3 = arith.truncf %2 : vector<128x128xf32> to vector<128x128xbf16>
    %c0_3 = arith.constant 0 : index
    %c0_4 = arith.constant 0 : index
    %4 = vector.load %arg3[%c0_3, %c0_4] : memref<1x128xbf16, #tpu.memory_space<vmem>>, vector<1x128xbf16>
    %5 = vector.broadcast %4 : vector<1x128xbf16> to vector<128x128xbf16>
    %6 = arith.addf %3, %5 : vector<128x128xbf16>
    %cst_5 = arith.constant 1.000980e-02 : bf16
    %7 = vector.broadcast %cst_5 : bf16 to vector<128x128xbf16>
    %8 = arith.mulf %7, %6 : vector<128x128xbf16>
    %9 = arith.maximumf %6, %8 : vector<128x128xbf16>
    %c0_6 = arith.constant 0 : index
    %c0_7 = arith.constant 0 : index
    %c0_8 = arith.constant 0 : index
    %10 = vector.load %arg4[%c0_6, %c0_7, %c0_8] : memref<4x128x128xbf16, #tpu.memory_space<vmem>>, vector<1x128x128xbf16>
    %11 = vector.shape_cast %10 : vector<1x128x128xbf16> to vector<128x128xbf16>
    %cst_9 = arith.constant dense<0.000000e+00> : vector<128x128xf32>
    %12 = tpu.matmul %9, %11, %cst_9 {dimension_numbers = #tpu.dot_dimension_numbers<[1], [0], [0], [1], [0, 0, 1, 1], [], []>} : vector<128x128xbf16>, vector<128x128xbf16>, vector<128x128xf32> -> vector<128x128xf32>
    %13 = arith.truncf %12 : vector<128x128xf32> to vector<128x128xbf16>
    %c0_10 = arith.constant 0 : index
    %c0_11 = arith.constant 0 : index
    %c0_12 = arith.constant 0 : index
    %14 = vector.load %arg5[%c0_10, %c0_11, %c0_12] : memref<4x1x128xbf16, #tpu.memory_space<vmem>>, vector<1x1x128xbf16>
    %15 = vector.shape_cast %14 : vector<1x1x128xbf16> to vector<1x128xbf16>
    %16 = vector.broadcast %15 : vector<1x128xbf16> to vector<128x128xbf16>
    %17 = arith.addf %13, %16 : vector<128x128xbf16>
    %cst_13 = arith.constant 0.000000e+00 : bf16
    %18 = vector.broadcast %cst_13 : bf16 to vector<128x128xbf16>
    %19 = arith.maximumf %17, %18 : vector<128x128xbf16>
    %20 = arith.addf %9, %19 : vector<128x128xbf16>
    %c1_i32 = arith.constant 1 : i32
    %21 = arith.index_cast %c1_i32 : i32 to index
    %c0_14 = arith.constant 0 : index
    %c0_15 = arith.constant 0 : index
    %22 = vector.load %arg4[%21, %c0_14, %c0_15] : memref<4x128x128xbf16, #tpu.memory_space<vmem>>, vector<1x128x128xbf16>
    %23 = vector.shape_cast %22 : vector<1x128x128xbf16> to vector<128x128xbf16>
    %cst_16 = arith.constant dense<0.000000e+00> : vector<128x128xf32>
    %24 = tpu.matmul %20, %23, %cst_16 {dimension_numbers = #tpu.dot_dimension_numbers<[1], [0], [0], [1], [0, 0, 1, 1], [], []>} : vector<128x128xbf16>, vector<128x128xbf16>, vector<128x128xf32> -> vector<128x128xf32>
    %25 = arith.truncf %24 : vector<128x128xf32> to vector<128x128xbf16>
    %26 = arith.index_cast %c1_i32 : i32 to index
    %c0_17 = arith.constant 0 : index
    %c0_18 = arith.constant 0 : index
    %27 = vector.load %arg5[%26, %c0_17, %c0_18] : memref<4x1x128xbf16, #tpu.memory_space<vmem>>, vector<1x1x128xbf16>
    %28 = vector.shape_cast %27 : vector<1x1x128xbf16> to vector<1x128xbf16>
    %29 = vector.broadcast %28 : vector<1x128xbf16> to vector<128x128xbf16>
    %30 = arith.addf %25, %29 : vector<128x128xbf16>
    %cst_19 = arith.constant 0.000000e+00 : bf16
    %31 = vector.broadcast %cst_19 : bf16 to vector<128x128xbf16>
    %32 = arith.maximumf %30, %31 : vector<128x128xbf16>
    %33 = arith.addf %20, %32 : vector<128x128xbf16>
    %c2_i32 = arith.constant 2 : i32
    %34 = arith.index_cast %c2_i32 : i32 to index
    %c0_20 = arith.constant 0 : index
    %c0_21 = arith.constant 0 : index
    %35 = vector.load %arg4[%34, %c0_20, %c0_21] : memref<4x128x128xbf16, #tpu.memory_space<vmem>>, vector<1x128x128xbf16>
    %36 = vector.shape_cast %35 : vector<1x128x128xbf16> to vector<128x128xbf16>
    %cst_22 = arith.constant dense<0.000000e+00> : vector<128x128xf32>
    %37 = tpu.matmul %33, %36, %cst_22 {dimension_numbers = #tpu.dot_dimension_numbers<[1], [0], [0], [1], [0, 0, 1, 1], [], []>} : vector<128x128xbf16>, vector<128x128xbf16>, vector<128x128xf32> -> vector<128x128xf32>
    %38 = arith.truncf %37 : vector<128x128xf32> to vector<128x128xbf16>
    %39 = arith.index_cast %c2_i32 : i32 to index
    %c0_23 = arith.constant 0 : index
    %c0_24 = arith.constant 0 : index
    %40 = vector.load %arg5[%39, %c0_23, %c0_24] : memref<4x1x128xbf16, #tpu.memory_space<vmem>>, vector<1x1x128xbf16>
    %41 = vector.shape_cast %40 : vector<1x1x128xbf16> to vector<1x128xbf16>
    %42 = vector.broadcast %41 : vector<1x128xbf16> to vector<128x128xbf16>
    %43 = arith.addf %38, %42 : vector<128x128xbf16>
    %cst_25 = arith.constant 0.000000e+00 : bf16
    %44 = vector.broadcast %cst_25 : bf16 to vector<128x128xbf16>
    %45 = arith.maximumf %43, %44 : vector<128x128xbf16>
    %46 = arith.addf %33, %45 : vector<128x128xbf16>
    %c3_i32 = arith.constant 3 : i32
    %47 = arith.index_cast %c3_i32 : i32 to index
    %c0_26 = arith.constant 0 : index
    %c0_27 = arith.constant 0 : index
    %48 = vector.load %arg4[%47, %c0_26, %c0_27] : memref<4x128x128xbf16, #tpu.memory_space<vmem>>, vector<1x128x128xbf16>
    %49 = vector.shape_cast %48 : vector<1x128x128xbf16> to vector<128x128xbf16>
    %cst_28 = arith.constant dense<0.000000e+00> : vector<128x128xf32>
    %50 = tpu.matmul %46, %49, %cst_28 {dimension_numbers = #tpu.dot_dimension_numbers<[1], [0], [0], [1], [0, 0, 1, 1], [], []>} : vector<128x128xbf16>, vector<128x128xbf16>, vector<128x128xf32> -> vector<128x128xf32>
    %51 = arith.truncf %50 : vector<128x128xf32> to vector<128x128xbf16>
    %52 = arith.index_cast %c3_i32 : i32 to index
    %c0_29 = arith.constant 0 : index
    %c0_30 = arith.constant 0 : index
    %53 = vector.load %arg5[%52, %c0_29, %c0_30] : memref<4x1x128xbf16, #tpu.memory_space<vmem>>, vector<1x1x128xbf16>
    %54 = vector.shape_cast %53 : vector<1x1x128xbf16> to vector<1x128xbf16>
    %55 = vector.broadcast %54 : vector<1x128xbf16> to vector<128x128xbf16>
    %56 = arith.addf %51, %55 : vector<128x128xbf16>
    %cst_31 = arith.constant 0.000000e+00 : bf16
    %57 = vector.broadcast %cst_31 : bf16 to vector<128x128xbf16>
    %58 = arith.maximumf %56, %57 : vector<128x128xbf16>
    %59 = arith.addf %46, %58 : vector<128x128xbf16>
    %c3_i32_32 = arith.constant 3 : i32
    %60 = arith.extf %58 : vector<128x128xbf16> to vector<128x128xf32>
    %c0_33 = arith.constant 0 : index
    %c0_34 = arith.constant 0 : index
    %61 = vector.load %arg6[%c0_33, %c0_34] : memref<128x128xf32, #tpu.memory_space<vmem>>, vector<128x128xf32>
    tpu.vector_store %arg6[%c0_33, %c0_34], %60 {strides = array<i32>} : memref<128x128xf32, #tpu.memory_space<vmem>>, vector<128x128xf32>,
    return
  }
  func.func @transform_0(%arg0: i32) -> (i32, i32) {
    %c0_i32 = arith.constant 0 : i32
    %c0_i32_0 = arith.constant 0 : i32
    return %arg0, %c0_i32 : i32, i32
  }
  func.func @transform_1(%arg0: i32) -> (i32, i32) {
    %c0_i32 = arith.constant 0 : i32
    %c0_i32_0 = arith.constant 0 : i32
    %c0_i32_1 = arith.constant 0 : i32
    return %c0_i32, %c0_i32_0 : i32, i32
  }
  func.func @transform_2(%arg0: i32) -> (i32, i32) {
    %c0_i32 = arith.constant 0 : i32
    %c0_i32_0 = arith.constant 0 : i32
    %c0_i32_1 = arith.constant 0 : i32
    return %c0_i32, %c0_i32_0 : i32, i32
  }
  func.func @transform_3(%arg0: i32) -> (i32, i32, i32) {
    %c0_i32 = arith.constant 0 : i32
    %c0_i32_0 = arith.constant 0 : i32
    %c0_i32_1 = arith.constant 0 : i32
    %c0_i32_2 = arith.constant 0 : i32
    return %c0_i32, %c0_i32_0, %c0_i32_1 : i32, i32, i32
  }
  func.func @transform_4(%arg0: i32) -> (i32, i32, i32) {
    %c0_i32 = arith.constant 0 : i32
    %c0_i32_0 = arith.constant 0 : i32
    %c0_i32_1 = arith.constant 0 : i32
    %c0_i32_2 = arith.constant 0 : i32
    return %c0_i32, %c0_i32_0, %c0_i32_1 : i32, i32, i32
  }
  func.func @transform_5(%arg0: i32) -> (i32, i32) {
    %c0_i32 = arith.constant 0 : i32
    %c0_i32_0 = arith.constant 0 : i32
    return %arg0, %c0_i32 : i32, i32
  }
}

</mosaic_0001>

<bundles_post_ra>
// kernel: tpu_custom_call.1
= control target key start
LH: loop header
LB: loop body
LE: loop exit
PB: predicated region body
PF: predicated region fallthrough
CT: control target
= control target key end

     0   :  { %10 = vsyncpa [#allocation3], 0  ;;  %s2793_s0 = inlined_call_operand.vmem [shape: bf16[256,32], index: 0, kind: input, shape index: {}]   ;;  %s2794_s1 = inlined_call_operand.vmem [shape: bf16[32,128], index: 1, kind: input, shape index: {}]   ;;  %s2795_s2 = inlined_call_operand.vmem [shape: bf16[1,128], index: 2, kind: input, shape index: {}]   ;;  %s2796_s3 = inlined_call_operand.hbm [shape: bf16[4,128,128], index: 3, kind: input, shape index: {}]   ;;  %s2797_s4 = inlined_call_operand.vmem [shape: bf16[4,1,128], index: 4, kind: input, shape index: {}]   ;;  %s2798_s5 = inlined_call_operand.hbm [shape: f32[256,128], index: 5, kind: output, shape index: {}]  }
   0x1   :  { %11 = vsyncpa [#allocation4], 0 }
   0x2   :  { %13 = vsyncpa [#allocation4 + $0x1], 0  ;;  %s2365_s18 = smov 0   ;;  %s2367_s19 = smov 0  }
   0x3   :  { %s2369_s20 = smov 0   ;;  %s2371_s21 = smov 0  }
   0x4 LB: > { %s2386_s22 = sadd.s32 4294967295, %s2328_s21   ;;  %s1936_s23 = sadd.s32 4294967294, %s2328_s21   ;;  %s2328_s21 = sphi %s2371_s21, %s2804_s21   ;;  %s2324_s20 = sphi %s2369_s20, %s2803_s20   ;;  %s2320_s19 = sphi %s2367_s19, %s2802_s19   ;;  %s2316_s18 = sphi %s2365_s18, %s2801_s18  }
   0x5   : > { %s2390_s24 = sadd.s32 1, %s2328_s21   ;;  %s136_s25 = sadd.s32 1, %s2324_s20 }
   0x6   : > { %s133_s26 = ssub.s32 %s2328_s21, %s2390_s24  ;;  %p146_p0 = scmp.ne.s32.totalorder %s2324_s20, %s2320_s19 }
   0x7   : > { %p134_p1 = scmp.eq.s32.totalorder %s133_s26, 0  ;;  %p147_p2 = scmp.eq.s32.totalorder %s2386_s22, 1 }
   0x8   : > { %p152_p3 = scmp.ne.s32.totalorder %s2320_s19, %s2316_s18  ;;  %p153_p4 = scmp.eq.s32.totalorder %s1936_s23, 1 }
   0x9   : > { %s2401_s27 = scalar_select %p134_p1, %s2324_s20, %s136_s25  }
   0xa   : > { %p2403_p5 = por %p147_p2, %p146_p0  ;;  %p2407_p6 = por %p153_p4, %p152_p3 }
   0xb   : > { %p1937_p7 = scmp.ge.s32.totalorder %s2328_s21, 1  ;;  %p160_p8 = scmp.lt.s32.totalorder %s2328_s21, 3 }
   0xc   : > { %p2192_p9 = scmp.eq.s32.totalorder %s2386_s22, 0  ;;  %s177_s7 = sshll.u32 %s2796_s3, 4  ;;  %s178_s7 = int_to_ptr.hbm [resolvable:$true] %s177_s7 }
   0xd   : > { %p161_p10 = pnand %p1937_p7, %p160_p8  ;;  %s2330_s8 = smov [#allocation2]  }
   0xe   : > { %s179_s9 = sshll.u32 %s2330_s8, 4  ;;  %s2331_s10 = smov 64   ;;  %s180_s9 = int_to_ptr.vmem [resolvable:$true] %s179_s9 }
   0xf   : > { %p2184_p11 = pneg %p161_p10  ;;  %s2332_s11 = smov 4  }
  0x10   : > { %207 = sbr.rel (%p161_p10) target bundleno = 916 (0x394), region = 40 }
  0x11   : > { %p2185_p12 = pnand %p2192_p9, %p2184_p11 }
  0x13   : > { %2187 = dma.hbm_to_vmem [thread:$0]  (!%p2185_p12), %s178_s7, 4096, %s180_s9, [#allocation3], %s2331_s10, %s2331_s10, %s2332_s11  }
  0x15   : > { %2307 = dma.done.wait (%p2192_p9), [#allocation3], 4096  }
  0x16   : > { %2309 = vsyncadd (%p2192_p9), [#allocation3], 4294963200  ;;  %s1943_s12 = sshll.u32 %s2386_s22, 4  ;;  %v2138_v0 = vld [vmem:[%s2794_s1 + $0x8] sm:$0xff]  ;;  %v2137_v1 = vld [vmem:[%s2794_s1] sm:$0xff]  ;;  %vm316_vm0 = vcmask 261120  }
  0x17   : > { %p237_p13 = scmp.lt.s32.totalorder %s1943_s12, 31  ;;  %347 = vmatpush.bf16.msra.mxu0 %v2138_v0  ;;  %2172 = vmatpush.bf16.msra.mxu1 %v2138_v0  ;;  %v2146_v6 = vld [vmem:[#allocation2 + $0x38] sm:$0xff]  ;;  %v2145_v11 = vld [vmem:[#allocation2 + $0x30] sm:$0xff]  ;;  %v2144_v12 = vld [vmem:[#allocation2 + $0x28] sm:$0xff]  ;;  %s233_s15 = sand.u32 1, %s2320_s19  }
  0x18   : > { %2173 = vmatpush.bf16.msra.mxu2 %v2138_v0  ;;  %2174 = vmatpush.bf16.msra.mxu3 %v2138_v0  ;;  %v2143_v13 = vld [vmem:[#allocation2 + $0x20] sm:$0xff]  ;;  %v2142_v14 = vld [vmem:[#allocation2 + $0x18] sm:$0xff]  ;;  %v2141_v15 = vld [vmem:[#allocation2 + $0x10] sm:$0xff]  ;;  %s1942_s16 = sshll.u32 %s233_s15, 7  ;;  %s2171_s23 = sshll.u32 %s2386_s22, 7 }
  0x19   : > { %s2806_s12 = smov (!%p237_p13, %s1943_s12), 31  ;;  %v2140_v16 = vld [vmem:[#allocation2 + $0x8] sm:$0xff]  ;;  %v406_v17 = vld [vmem:[%s2795_s2] sm:$0x1]  ;;  %s2726_s17 = scalar_lea.vmem [#allocation5], %s1942_s16 }
  0x1a   : > { %s1944_s13 = sshll.u32 %s2806_s12, 2  ;;  %v2139_v18 = vld [vmem:[#allocation2] sm:$0xff]  ;;  %v408_v19 = vpack.i.b16 %v406_v17, %v406_v17  ;;  %s1858_s30 = scalar_lea.hbm %s2798_s5, %s2171_s23 }
  0x1b   : > { %s240_s26 = scalar_lea.vmem %s2793_s0, %s1944_s13  ;;  %348 = vmatpush.bf16.msra.mxu0 %v2137_v1  ;;  %2175 = vmatpush.bf16.msra.mxu1 %v2137_v1  ;;  %s1859_s6 = sshll.u32 %s2726_s17, 4  ;;  %s1860_s6 = int_to_ptr.vmem [resolvable:$true] %s1859_s6 }
  0x1c   : > { %v2129_v2 = vld [vmem:[%s240_s26] sm:$0xff]  ;;  %v2131_v3 = vld [vmem:[%s240_s26 + $0x10] sm:$0xff]  ;;  %2176 = vmatpush.bf16.msra.mxu2 %v2137_v1  ;;  %2177 = vmatpush.bf16.msra.mxu3 %v2137_v1  ;;  %v2136_v5 = vld [vmem:[%s240_s26 + $0x38] sm:$0xff]  ;;  %v410_v20 = vperm.slane %v408_v19, 0  ;;  %s1861_s7 = sshll.u32 %s1858_s30, 4  ;;  %s1847_s22 = scalar_lea.sflag [#allocation4], %s233_s15  ;;  %s1862_s7 = int_to_ptr.hbm [resolvable:$true] %s1861_s7 }
  0x1d   : > { %v2133_v4 = vld [vmem:[%s240_s26 + $0x20] sm:$0xff]  ;;  %v2130_v7 = vld [vmem:[%s240_s26 + $0x8] sm:$0xff]  ;;  %v2132_v8 = vld [vmem:[%s240_s26 + $0x18] sm:$0xff]  ;;  %s2276_s8 = sshra.s32 %s1862_s7, 4  ;;  %s2282_s12 = scalar_lea.hbm %s2798_s5, 256  ;;  %s2277_s8 = int_to_ptr.hbm [resolvable:$true] %s2276_s8 }
  0x1e   : > { %1985 = vmatmul.msk.bf16.vlgmr.msra.gmra.mxu0 %vm316_vm0, %v2129_v2  ;;  %1987 = vmatmul.msk.bf16.vlgmr.msra.gmra.mxu1 %vm316_vm0, %v2131_v3  ;;  %v2134_v9 = vld [vmem:[%s240_s26 + $0x28] sm:$0xff]  ;;  %v2135_v10 = vld [vmem:[%s240_s26 + $0x30] sm:$0xff]  ;;  %v2444_v23 = vunpack.c.l.bf16 %v410_v20  ;;  %s2278_s9 = scalar_lea.hbm %s2277_s8, 128  ;;  %p2283_p3 = scmp.lt.s32.totalorder %s2277_s8, %s2798_s5 }
  0x1f   : > { %1989 = vmatmul.msk.bf16.vlgmr.msra.gmra.mxu2 %vm316_vm0, %v2133_v4  ;;  %1992 = vmatmul.msk.bf16.vlgmr.msra.gmra.mxu3 %vm316_vm0, %v2136_v5  ;;  %p2279_p0 = scmp.ne.s32.totalorder %s2277_s8, %s2278_s9  ;;  %p2284_p4 = scmp.lt.s32.totalorder %s2282_s12, %s2278_s9 }
  0x20   : > { %668 = vmatpush.bf16.msrb.mxu1 %v2146_v6 }
  0x21   : > { %p2280_p1 = pnand %p2279_p0, %p2403_p5  ;;  %p2285_p7 = por %p2284_p4, %p2283_p3 }
  0x23   : > { %p2281_p2 = pneg %p2280_p1 }
  0x24   : > { %669 = vmatpush.bf16.msrb.mxu1 %v2145_v11 }
  0x25   : > { %p2286_p8 = pnand %p2285_p7, %p2281_p2 }
  0x28   : > { %670 = vmatpush.bf16.msrb.mxu1 %v2144_v12 }
  0x2c   : > { %671 = vmatpush.bf16.msrb.mxu1 %v2143_v13 }
  0x2e   : > { %1986 = vmatmul.msk.bf16.gmra.mxu0 %vm316_vm0, %v2130_v7  ;;  %1988 = vmatmul.msk.bf16.gmra.mxu1 %vm316_vm0, %v2132_v8 }
  0x2f   : > { %1990 = vmatmul.msk.bf16.gmra.mxu2 %vm316_vm0, %v2134_v9 }
  0x30   : > { %672 = vmatpush.bf16.msrb.mxu1 %v2142_v14 }
  0x34   : > { %673 = vmatpush.bf16.msrb.mxu1 %v2141_v15 }
  0x38   : > { %674 = vmatpush.bf16.msrb.mxu1 %v2140_v16 }
  0x3c   : > { %675 = vmatpush.bf16.msrb.mxu1 %v2139_v18 }
  0x3f   : > { %1991 = vmatmul.msk.bf16.gmra.mxu2 %vm316_vm0, %v2135_v10 }
  0x9b   : > { %v350_v21 = vpop.f32.mrf.mxu0  ;;  %v360_v26 = vpop.f32.mrf.mxu1 }
  0x9c   : > { %v390_v22 = vpack.c.bf16 %v350_v21, %v350_v21  ;;  %v394_v45 = vpack.c.bf16 %v360_v26, %v360_v26 }
  0x9e   : > { %v411_v24 = vunpack.c.l.bf16 %v390_v22  ;;  %v415_v54 = vunpack.c.l.bf16 %v394_v45 }
  0xa0   : > { %v428_v25 = vadd.f32 %v2444_v23, %v411_v24  ;;  %v432_v61 = vadd.f32 %v2444_v23, %v415_v54 }
  0xa2   : > { %v444_v27 = vpack.c.bf16 %v428_v25, %v428_v25  ;;  %v448_v2 = vpack.c.bf16 %v432_v61, %v432_v61  ;;  %v370_v3 = vpop.f32.mrf.mxu2 }
  0xa3   : > { %v352_v28 = vpop.f32.mrf.mxu0  ;;  %v362_v36 = vpop.f32.mrf.mxu1 }
  0xa4   : > { %v460_v29 = vunpack.c.l.bf16 %v444_v27  ;;  %v391_v30 = vpack.c.bf16 %v352_v28, %v352_v28  ;;  %v395_v48 = vpack.c.bf16 %v362_v36, %v362_v36  ;;  %v464_v9 = vunpack.c.l.bf16 %v448_v2 }
  0xa6   : > { %v412_v31 = vunpack.c.l.bf16 %v391_v30  ;;  %v476_v32 = vmul.f32 0.010009766, %v460_v29  ;;  %v416_v58 = vunpack.c.l.bf16 %v395_v48  ;;  %v480_v16 = vmul.f32 0.010009766, %v464_v9 }
  0xa8   : > { %v429_v33 = vadd.f32 %v2444_v23, %v412_v31  ;;  %v524_v37 = vmax.f32 %v460_v29, %v476_v32  ;;  %v433_v63 = vadd.f32 %v2444_v23, %v416_v58  ;;  %v528_v22 = vmax.f32 %v464_v9, %v480_v16 }
  0xa9   : > { %v398_v31 = vpack.c.bf16 %v370_v3, %v370_v3 }
  0xaa   : > { %v445_v34 = vpack.c.bf16 %v429_v33, %v429_v33  ;;  %v2448_v42 = vpack.c.bf16 %v524_v37, %v524_v37  ;;  %v449_v5 = vpack.c.bf16 %v433_v63, %v433_v63  ;;  %v372_v21 = vpop.f32.mrf.mxu2  ;;  %v2466_v27 = vpack.c.bf16 %v528_v22, %v528_v22 }
  0xab   : > { %v355_v35 = vpop.f32.mrf.mxu0  ;;  %v365_v55 = vpop.f32.mrf.mxu1  ;;  %v399_v37 = vpack.c.bf16 %v372_v21, %v372_v21 }
  0xac   : > { %v461_v38 = vunpack.c.l.bf16 %v445_v34  ;;  %v392_v39 = vpack.c.bf16 %v355_v35, %v355_v35  ;;  %v588_v52 = vunpack.c.l.b16 %v2448_v42  ;;  %v465_v10 = vunpack.c.l.bf16 %v449_v5 }
  0xad   : > { %v396_v11 = vpack.c.bf16 %v365_v55, %v365_v55  ;;  %v592_v32 = vunpack.c.l.b16 %v2466_v27 }
  0xae   : > { %v477_v40 = vmul.f32 0.010009766, %v461_v38  ;;  %v413_v41 = vunpack.c.l.bf16 %v392_v39  ;;  %v481_v17 = vmul.f32 0.010009766, %v465_v10 }
  0xaf   : > { %v417_v18 = vunpack.c.l.bf16 %v396_v11 }
  0xb0   : > { %v525_v43 = vmax.f32 %v461_v38, %v477_v40  ;;  %v430_v44 = vadd.f32 %v2444_v23, %v413_v41  ;;  %v529_v26 = vmax.f32 %v465_v10, %v481_v17  ;;  %v419_v38 = vunpack.c.l.bf16 %v398_v31 }
  0xb1   : > { %v434_v24 = vadd.f32 %v2444_v23, %v417_v18 }
  0xb2   : > { %v2451_v46 = vpack.c.bf16 %v525_v43, %v525_v43  ;;  %v446_v47 = vpack.c.bf16 %v430_v44, %v430_v44  ;;  %v2468_v30 = vpack.c.bf16 %v529_v26, %v529_v26  ;;  %v375_v33 = vpop.f32.mrf.mxu2  ;;  %v420_v43 = vunpack.c.l.bf16 %v399_v37  ;;  %v2154_v26 = vld [vmem:[#allocation2 + $0x78] sm:$0xff] }
  0xb3   : > { %v357_v49 = vpop.f32.mrf.mxu0  ;;  %v367_v6 = vpop.f32.mrf.mxu1  ;;  %v450_v28 = vpack.c.bf16 %v434_v24, %v434_v24  ;;  %v436_v44 = vadd.f32 %v2444_v23, %v419_v38  ;;  %v400_v55 = vpack.c.bf16 %v375_v33, %v375_v33  ;;  %1012 = vmatpush.bf16.msrb.mxu2 %v2154_v26 }
  0xb4   : > { %v462_v50 = vunpack.c.l.bf16 %v446_v47  ;;  %v393_v51 = vpack.c.bf16 %v357_v49, %v357_v49  ;;  %v589_v53 = vunpack.c.l.b16 %v2451_v46  ;;  %v397_v13 = vpack.c.bf16 %v367_v6, %v367_v6 }
  0xb5   : > { %v466_v34 = vunpack.c.l.bf16 %v450_v28  ;;  %v593_v36 = vunpack.c.l.b16 %v2468_v30  ;;  %v437_v45 = vadd.f32 %v2444_v23, %v420_v43 }
  0xb6   : > { %v414_v56 = vunpack.c.l.bf16 %v393_v51  ;;  %v604_v57 = vpack.c.b16 %v589_v53, %v588_v52  ;;  %v478_v59 = vmul.f32 0.010009766, %v462_v50  ;;  %v418_v20 = vunpack.c.l.bf16 %v397_v13 }
  0xb7   : > { %v482_v39 = vmul.f32 0.010009766, %v466_v34  ;;  %v606_v41 = vpack.c.b16 %v593_v36, %v592_v32  ;;  %v453_v51 = vpack.c.bf16 %v437_v45, %v437_v45 }
  0xb8   : > { %v431_v60 = vadd.f32 %v2444_v23, %v414_v56  ;;  %676 = vmatmul.bf16.vlgmr.msrb.gmra.mxu1 %v604_v57  ;;  %v526_v1 = vmax.f32 %v462_v50, %v478_v59  ;;  %v435_v25 = vadd.f32 %v2444_v23, %v418_v20  ;;  %v452_v50 = vpack.c.bf16 %v436_v44, %v436_v44  ;;  %v385_v20 = vpop.f32.mrf.mxu3 }
  0xb9   : > { %v530_v47 = vmax.f32 %v466_v34, %v482_v39  ;;  %v469_v56 = vunpack.c.l.bf16 %v453_v51  ;;  %v404_v39 = vpack.c.bf16 %v385_v20, %v385_v20  ;;  %v2153_v51 = vld [vmem:[#allocation2 + $0x70] sm:$0xff]  ;;  %v2148_v20 = vld [vmem:[#allocation2 + $0x48] sm:$0xff] }
  0xba   : > { %v447_v62 = vpack.c.bf16 %v431_v60, %v431_v60  ;;  %v2458_v8 = vpack.c.bf16 %v526_v1, %v526_v1  ;;  %v451_v29 = vpack.c.bf16 %v435_v25, %v435_v25  ;;  %v377_v49 = vpop.f32.mrf.mxu2  ;;  %v468_v54 = vunpack.c.l.bf16 %v452_v50  ;;  %1013 = vmatpush.bf16.msrb.mxu2 %v2153_v51 }
  0xbb   : > { %v2474_v52 = vpack.c.bf16 %v530_v47, %v530_v47  ;;  %v401_v59 = vpack.c.bf16 %v377_v49, %v377_v49  ;;  %v421_v60 = vunpack.c.l.bf16 %v400_v55  ;;  %v485_v63 = vmul.f32 0.010009766, %v469_v56 }
  0xbc   : > { %v463_v0 = vunpack.c.l.bf16 %v447_v62  ;;  %v590_v14 = vunpack.c.l.b16 %v2458_v8  ;;  %v467_v35 = vunpack.c.l.bf16 %v451_v29  ;;  %v484_v62 = vmul.f32 0.010009766, %v468_v54 }
  0xbd   : > { %v594_v57 = vunpack.c.l.b16 %v2474_v52  ;;  %v422_v1 = vunpack.c.l.bf16 %v401_v59  ;;  %v438_v2 = vadd.f32 %v2444_v23, %v421_v60  ;;  %v533_v5 = vmax.f32 %v469_v56, %v485_v63  ;;  %v2151_v63 = vld [vmem:[#allocation2 + $0x60] sm:$0xff] }
  0xbe   : > { %v479_v4 = vmul.f32 0.010009766, %v463_v0  ;;  %v483_v40 = vmul.f32 0.010009766, %v467_v35 }
  0xbf   : > { %v439_v3 = vadd.f32 %v2444_v23, %v422_v1  ;;  %v454_v6 = vpack.c.bf16 %v438_v2, %v438_v2  ;;  %v2484_v10 = vpack.c.bf16 %v533_v5, %v533_v5 }
  0xc0   : > { %v527_v7 = vmax.f32 %v463_v0, %v479_v4  ;;  %v531_v48 = vmax.f32 %v467_v35, %v483_v40  ;;  %v532_v4 = vmax.f32 %v468_v54, %v484_v62  ;;  %v387_v37 = vpop.f32.mrf.mxu3 }
  0xc1   : > { %v470_v13 = vunpack.c.l.bf16 %v454_v6  ;;  %v597_v17 = vunpack.c.l.b16 %v2484_v10  ;;  %v405_v44 = vpack.c.bf16 %v387_v37, %v387_v37 }
  0xc2   : > { %v2460_v12 = vpack.c.bf16 %v527_v7, %v527_v7  ;;  %v2476_v53 = vpack.c.bf16 %v531_v48, %v531_v48  ;;  %v380_v61 = vpop.f32.mrf.mxu2  ;;  %v455_v7 = vpack.c.bf16 %v439_v3, %v439_v3  ;;  %v2482_v9 = vpack.c.bf16 %v532_v4, %v532_v4 }
  0xc3   : > { %v486_v21 = vmul.f32 0.010009766, %v470_v13  ;;  %v425_v48 = vunpack.c.l.bf16 %v404_v39  ;;  %v426_v50 = vunpack.c.l.bf16 %v405_v44 }
  0xc4   : > { %v591_v15 = vunpack.c.l.b16 %v2460_v12  ;;  %v595_v58 = vunpack.c.l.b16 %v2476_v53  ;;  %v596_v16 = vunpack.c.l.b16 %v2482_v9 }
  0xc5   : > { %v534_v31 = vmax.f32 %v470_v13, %v486_v21  ;;  %v442_v54 = vadd.f32 %v2444_v23, %v425_v48  ;;  %v443_v55 = vadd.f32 %v2444_v23, %v426_v50 }
  0xc6   : > { %v605_v19 = vpack.c.b16 %v591_v15, %v590_v14  ;;  %v607_v0 = vpack.c.b16 %v595_v58, %v594_v57  ;;  %v402_v14 = vpack.c.bf16 %v380_v61, %v380_v61  ;;  %v471_v15 = vunpack.c.l.bf16 %v455_v7  ;;  %v2152_v58 = vld [vmem:[#allocation2 + $0x68] sm:$0xff] }
  0xc7   : > { %v608_v24 = vpack.c.b16 %v597_v17, %v596_v16  ;;  %v2490_v35 = vpack.c.bf16 %v534_v31, %v534_v31  ;;  %v458_v59 = vpack.c.bf16 %v442_v54, %v442_v54  ;;  %v459_v60 = vpack.c.bf16 %v443_v55, %v443_v55  ;;  %1014 = vmatpush.bf16.msrb.mxu2 %v2152_v58  ;;  %v2150_v16 = vld [vmem:[#allocation2 + $0x58] sm:$0xff] }
  0xc8   : > { %681 = vmatmul.bf16.gmra.mxu1 %v605_v19  ;;  %v423_v19 = vunpack.c.l.bf16 %v402_v14  ;;  %v487_v22 = vmul.f32 0.010009766, %v471_v15 }
  0xc9   : > { %v475_v1 = vunpack.c.l.bf16 %v459_v60 }
  0xca   : > { %v382_v11 = vpop.f32.mrf.mxu2  ;;  %v440_v28 = vadd.f32 %v2444_v23, %v423_v19  ;;  %v535_v32 = vmax.f32 %v471_v15, %v487_v22  ;;  %v733_v19 = vld [vmem:[%s2797_s4] sm:$0x1] }
  0xcb   : > { %v403_v18 = vpack.c.bf16 %v382_v11, %v382_v11  ;;  %1015 = vmatpush.bf16.msrb.mxu2 %v2151_v63  ;;  %v491_v4 = vmul.f32 0.010009766, %v475_v1  ;;  %v735_v21 = vpack.i.b16 %v733_v19, %v733_v19  ;;  %v2147_v22 = vld [vmem:[#allocation2 + $0x40] sm:$0xff] }
  0xcc   : > { %v456_v33 = vpack.c.bf16 %v440_v28, %v440_v28  ;;  %v2492_v36 = vpack.c.bf16 %v535_v32, %v535_v32 }
  0xcd   : > { %v424_v25 = vunpack.c.l.bf16 %v403_v18  ;;  %v539_v7 = vmax.f32 %v475_v1, %v491_v4  ;;  %v2149_v18 = vld [vmem:[#allocation2 + $0x50] sm:$0xff] }
  0xce   : > { %v472_v38 = vunpack.c.l.bf16 %v456_v33  ;;  %v599_v43 = vunpack.c.l.b16 %v2492_v36 }
  0xcf   : > { %v441_v29 = vadd.f32 %v2444_v23, %v424_v25  ;;  %v2506_v13 = vpack.c.bf16 %v539_v7, %v539_v7  ;;  %1016 = vmatpush.bf16.msrb.mxu2 %v2150_v16 }
  0xd0   : > { %v488_v45 = vmul.f32 0.010009766, %v472_v38 }
  0xd1   : > { %v457_v34 = vpack.c.bf16 %v441_v29, %v441_v29  ;;  %v603_v15 = vunpack.c.l.b16 %v2506_v13 }
  0xd2   : > { %v536_v56 = vmax.f32 %v472_v38, %v488_v45 }
  0xd3   : > { %v473_v40 = vunpack.c.l.bf16 %v457_v34  ;;  %1017 = vmatpush.bf16.msrb.mxu2 %v2149_v18 }
  0xd4   : > { %v2498_v61 = vpack.c.bf16 %v536_v56, %v536_v56 }
  0xd5   : > { %v489_v47 = vmul.f32 0.010009766, %v473_v40 }
  0xd6   : > { %v600_v2 = vunpack.c.l.b16 %v2498_v61 }
  0xd7   : > { %v537_v57 = vmax.f32 %v473_v40, %v489_v47  ;;  %1018 = vmatpush.bf16.msrb.mxu2 %v2148_v20 }
  0xd8   : > { %686 = vmatmul.bf16.gmra.mxu1 %v606_v41  ;;  %v598_v41 = vunpack.c.l.b16 %v2490_v35 }
  0xd9   : > { %v2500_v62 = vpack.c.bf16 %v537_v57, %v537_v57 }
  0xda   : > { %v609_v49 = vpack.c.b16 %v599_v43, %v598_v41  ;;  %v835_v41 = vunpack.c.l.bf16 %v2448_v42 }
  0xdb   : > { %v601_v3 = vunpack.c.l.b16 %v2500_v62  ;;  %1019 = vmatpush.bf16.msrb.mxu2 %v2147_v22 }
  0xdd   : > { %v610_v5 = vpack.c.b16 %v601_v3, %v600_v2 }
  0xe8   : > { %691 = vmatmul.bf16.gmra.mxu1 %v607_v0  ;;  %v474_v0 = vunpack.c.l.bf16 %v458_v59 }
  0xea   : > { %v490_v23 = vmul.f32 0.010009766, %v474_v0 }
  0xec   : > { %v538_v6 = vmax.f32 %v474_v0, %v490_v23  ;;  %v837_v23 = vunpack.c.l.bf16 %v2458_v8 }
  0xee   : > { %v2504_v11 = vpack.c.bf16 %v538_v6, %v538_v6 }
  0xf0   : > { %v602_v14 = vunpack.c.l.b16 %v2504_v11 }
  0xf2   : > { %v611_v17 = vpack.c.b16 %v603_v15, %v602_v14  ;;  %v838_v15 = vunpack.c.l.bf16 %v2460_v12 }
  0xf8   : > { %696 = vmatmul.bf16.gmra.mxu1 %v608_v24  ;;  %v737_v24 = vperm.slane %v735_v21, 0 }
  0xfa   : > { %v2513_v28 = vunpack.c.l.bf16 %v737_v24 }
 0x108   : > { %701 = vmatmul.bf16.gmra.mxu1 %v609_v49  ;;  %v836_v49 = vunpack.c.l.bf16 %v2451_v46 }
 0x118   : > { %706 = vmatmul.bf16.gmra.mxu1 %v610_v5 }
 0x128   : > { %711 = vmatmul.bf16.gmra.mxu1 %v611_v17 }
 0x135   : > { %v677_v25 = vpop.f32.mrf.mxu1 }
 0x136   : > { %v717_v26 = vpack.c.bf16 %v677_v25, %v677_v25 }
 0x138   : > { %v738_v29 = vunpack.c.l.bf16 %v717_v26 }
 0x13a   : > { %v755_v31 = vadd.f32 %v2513_v28, %v738_v29 }
 0x13c   : > { %v803_v32 = vmax.f32 %v755_v31, 0.0 }
 0x13d   : > { %v679_v33 = vpop.f32.mrf.mxu1 }
 0x13e   : > { %v819_v34 = vpack.c.bf16 %v803_v32, %v803_v32  ;;  %v718_v37 = vpack.c.bf16 %v679_v33, %v679_v33 }
 0x140   : > { %v739_v38 = vunpack.c.l.bf16 %v718_v37  ;;  %v851_v39 = vunpack.c.l.bf16 %v819_v34  ;;  %v839_v34 = vunpack.c.l.bf16 %v2466_v27 }
 0x142   : > { %v756_v40 = vadd.f32 %v2513_v28, %v739_v38  ;;  %v867_v45 = vadd.f32 %v851_v39, %v835_v41 }
 0x144   : > { %v804_v43 = vmax.f32 %v756_v40, 0.0  ;;  %v2519_v54 = vpack.c.bf16 %v867_v45, %v867_v45 }
 0x145   : > { %v682_v44 = vpop.f32.mrf.mxu1 }
 0x146   : > { %v820_v47 = vpack.c.bf16 %v804_v43, %v804_v43  ;;  %v719_v48 = vpack.c.bf16 %v682_v44, %v682_v44  ;;  %v932_v63 = vunpack.c.l.b16 %v2519_v54  ;;  %v840_v43 = vunpack.c.l.bf16 %v2468_v30 }
 0x148   : > { %v852_v50 = vunpack.c.l.bf16 %v820_v47  ;;  %v740_v51 = vunpack.c.l.bf16 %v719_v48 }
 0x14a   : > { %v868_v55 = vadd.f32 %v852_v50, %v836_v49  ;;  %v757_v56 = vadd.f32 %v2513_v28, %v740_v51 }
 0x14c   : > { %v2522_v57 = vpack.c.bf16 %v868_v55, %v868_v55  ;;  %v805_v58 = vmax.f32 %v757_v56, 0.0 }
 0x14d   : > { %v684_v59 = vpop.f32.mrf.mxu1 }
 0x14e   : > { %v821_v60 = vpack.c.bf16 %v805_v58, %v805_v58  ;;  %v720_v42 = vpack.c.bf16 %v684_v59, %v684_v59  ;;  %v933_v0 = vunpack.c.l.b16 %v2522_v57 }
 0x150   : > { %v741_v1 = vunpack.c.l.bf16 %v720_v42  ;;  %v948_v2 = vpack.c.b16 %v933_v0, %v932_v63  ;;  %v853_v46 = vunpack.c.l.bf16 %v821_v60  ;;  %v841_v0 = vunpack.c.l.bf16 %v2474_v52 }
 0x152   : > { %v758_v3 = vadd.f32 %v2513_v28, %v741_v1  ;;  %1020 = vmatmul.bf16.vlgmr.msrb.gmra.mxu2 %v948_v2  ;;  %v869_v14 = vadd.f32 %v853_v46, %v837_v23 }
 0x154   : > { %v806_v4 = vmax.f32 %v758_v3, 0.0  ;;  %v2530_v20 = vpack.c.bf16 %v869_v14, %v869_v14 }
 0x155   : > { %v687_v5 = vpop.f32.mrf.mxu1 }
 0x156   : > { %v822_v6 = vpack.c.bf16 %v806_v4, %v806_v4  ;;  %v721_v7 = vpack.c.bf16 %v687_v5, %v687_v5  ;;  %v934_v26 = vunpack.c.l.b16 %v2530_v20  ;;  %v842_v4 = vunpack.c.l.bf16 %v2476_v53 }
 0x158   : > { %v854_v16 = vunpack.c.l.bf16 %v822_v6  ;;  %v742_v17 = vunpack.c.l.bf16 %v721_v7 }
 0x15a   : > { %v759_v18 = vadd.f32 %v2513_v28, %v742_v17  ;;  %v870_v19 = vadd.f32 %v854_v16, %v838_v15 }
 0x15c   : > { %v807_v21 = vmax.f32 %v759_v18, 0.0  ;;  %v2532_v22 = vpack.c.bf16 %v870_v19, %v870_v19 }
 0x15d   : > { %v689_v24 = vpop.f32.mrf.mxu1 }
 0x15e   : > { %v823_v25 = vpack.c.bf16 %v807_v21, %v807_v21  ;;  %v722_v8 = vpack.c.bf16 %v689_v24, %v689_v24  ;;  %v935_v29 = vunpack.c.l.b16 %v2532_v22 }
 0x160   : > { %v743_v31 = vunpack.c.l.bf16 %v722_v8  ;;  %v949_v32 = vpack.c.b16 %v935_v29, %v934_v26  ;;  %v855_v12 = vunpack.c.l.bf16 %v823_v25  ;;  %v843_v29 = vunpack.c.l.bf16 %v2482_v9 }
 0x162   : > { %v760_v33 = vadd.f32 %v2513_v28, %v743_v31  ;;  %1025 = vmatmul.bf16.gmra.mxu2 %v949_v32  ;;  %v871_v41 = vadd.f32 %v855_v12, %v839_v34 }
 0x164   : > { %v808_v37 = vmax.f32 %v760_v33, 0.0  ;;  %v2540_v49 = vpack.c.bf16 %v871_v41, %v871_v41 }
 0x165   : > { %v692_v38 = vpop.f32.mrf.mxu1 }
 0x166   : > { %v824_v39 = vpack.c.bf16 %v808_v37, %v808_v37  ;;  %v723_v40 = vpack.c.bf16 %v692_v38, %v692_v38  ;;  %v936_v58 = vunpack.c.l.b16 %v2540_v49  ;;  %v844_v37 = vunpack.c.l.bf16 %v2484_v10 }
 0x168   : > { %v856_v44 = vunpack.c.l.bf16 %v824_v39  ;;  %v744_v45 = vunpack.c.l.bf16 %v723_v40 }
 0x16a   : > { %v761_v47 = vadd.f32 %v2513_v28, %v744_v45  ;;  %v872_v48 = vadd.f32 %v856_v44, %v840_v43 }
 0x16c   : > { %v809_v50 = vmax.f32 %v761_v47, 0.0  ;;  %v2542_v51 = vpack.c.bf16 %v872_v48, %v872_v48 }
 0x16d   : > { %v694_v55 = vpop.f32.mrf.mxu1 }
 0x16e   : > { %v825_v56 = vpack.c.bf16 %v809_v50, %v809_v50  ;;  %v724_v27 = vpack.c.bf16 %v694_v55, %v694_v55  ;;  %v937_v59 = vunpack.c.l.b16 %v2542_v51 }
 0x170   : > { %v745_v60 = vunpack.c.l.bf16 %v724_v27  ;;  %v950_v42 = vpack.c.b16 %v937_v59, %v936_v58  ;;  %v857_v30 = vunpack.c.l.bf16 %v825_v56  ;;  %v845_v59 = vunpack.c.l.bf16 %v2490_v35 }
 0x172   : > { %v762_v63 = vadd.f32 %v2513_v28, %v745_v60  ;;  %1030 = vmatmul.bf16.gmra.mxu2 %v950_v42  ;;  %v873_v23 = vadd.f32 %v857_v30, %v841_v0 }
 0x174   : > { %v810_v1 = vmax.f32 %v762_v63, 0.0  ;;  %v2550_v15 = vpack.c.bf16 %v873_v23, %v873_v23 }
 0x175   : > { %v697_v2 = vpop.f32.mrf.mxu1 }
 0x176   : > { %v826_v46 = vpack.c.bf16 %v810_v1, %v810_v1  ;;  %v725_v3 = vpack.c.bf16 %v697_v2, %v697_v2  ;;  %v938_v21 = vunpack.c.l.b16 %v2550_v15  ;;  %v846_v1 = vunpack.c.l.bf16 %v2492_v36 }
 0x178   : > { %v858_v5 = vunpack.c.l.bf16 %v826_v46  ;;  %v746_v6 = vunpack.c.l.bf16 %v725_v3 }
 0x17a   : > { %v763_v7 = vadd.f32 %v2513_v28, %v746_v6  ;;  %v874_v14 = vadd.f32 %v858_v5, %v842_v4 }
 0x17c   : > { %v811_v16 = vmax.f32 %v763_v7, 0.0  ;;  %v2552_v17 = vpack.c.bf16 %v874_v14, %v874_v14 }
 0x17d   : > { %v699_v18 = vpop.f32.mrf.mxu1 }
 0x17e   : > { %v827_v19 = vpack.c.bf16 %v811_v16, %v811_v16  ;;  %v726_v52 = vpack.c.bf16 %v699_v18, %v699_v18  ;;  %v939_v24 = vunpack.c.l.b16 %v2552_v17 }
 0x180   : > { %v747_v25 = vunpack.c.l.bf16 %v726_v52  ;;  %v951_v8 = vpack.c.b16 %v939_v24, %v938_v21  ;;  %v859_v53 = vunpack.c.l.bf16 %v827_v19  ;;  %v2162_v24 = vld [vmem:[#allocation2 + $0xb8] sm:$0xff] }
 0x181   : > { %1357 = vmatpush.bf16.msrb.mxu3 %v2162_v24 }
 0x182   : > { %v764_v26 = vadd.f32 %v2513_v28, %v747_v25  ;;  %1035 = vmatmul.bf16.gmra.mxu2 %v951_v8  ;;  %v875_v34 = vadd.f32 %v859_v53, %v843_v29  ;;  %v847_v25 = vunpack.c.l.bf16 %v2498_v61 }
 0x184   : > { %v812_v31 = vmax.f32 %v764_v26, 0.0  ;;  %v2560_v43 = vpack.c.bf16 %v875_v34, %v875_v34 }
 0x185   : > { %v702_v32 = vpop.f32.mrf.mxu1 }
 0x186   : > { %v828_v12 = vpack.c.bf16 %v812_v31, %v812_v31  ;;  %v727_v33 = vpack.c.bf16 %v702_v32, %v702_v32  ;;  %v940_v50 = vunpack.c.l.b16 %v2560_v43  ;;  %v848_v32 = vunpack.c.l.bf16 %v2500_v62 }
 0x188   : > { %v860_v38 = vunpack.c.l.bf16 %v828_v12  ;;  %v748_v39 = vunpack.c.l.bf16 %v727_v33 }
 0x18a   : > { %v765_v40 = vadd.f32 %v2513_v28, %v748_v39  ;;  %v876_v41 = vadd.f32 %v860_v38, %v844_v37 }
 0x18c   : > { %v813_v44 = vmax.f32 %v765_v40, 0.0  ;;  %v2562_v45 = vpack.c.bf16 %v876_v41, %v876_v41 }
 0x18d   : > { %v704_v47 = vpop.f32.mrf.mxu1 }
 0x18e   : > { %v829_v48 = vpack.c.bf16 %v813_v44, %v813_v44  ;;  %v728_v9 = vpack.c.bf16 %v704_v47, %v704_v47  ;;  %v941_v55 = vunpack.c.l.b16 %v2562_v45 }
 0x190   : > { %v749_v56 = vunpack.c.l.bf16 %v728_v9  ;;  %v952_v27 = vpack.c.b16 %v941_v55, %v940_v50  ;;  %v861_v10 = vunpack.c.l.bf16 %v829_v48 }
 0x192   : > { %v766_v58 = vadd.f32 %v2513_v28, %v749_v56  ;;  %1040 = vmatmul.bf16.gmra.mxu2 %v952_v27  ;;  %v877_v0 = vadd.f32 %v861_v10, %v845_v59  ;;  %v849_v56 = vunpack.c.l.bf16 %v2504_v11  ;;  %v2161_v59 = vld [vmem:[#allocation2 + $0xb0] sm:$0xff]  ;;  %v2159_v11 = vld [vmem:[#allocation2 + $0xa0] sm:$0xff] }
 0x193   : > { %1358 = vmatpush.bf16.msrb.mxu3 %v2161_v59 }
 0x194   : > { %v814_v60 = vmax.f32 %v766_v58, 0.0  ;;  %v2570_v4 = vpack.c.bf16 %v877_v0, %v877_v0  ;;  %v2160_v0 = vld [vmem:[#allocation2 + $0xa8] sm:$0xff] }
 0x195   : > { %v707_v42 = vpop.f32.mrf.mxu1 }
 0x196   : > { %v830_v30 = vpack.c.bf16 %v814_v60, %v814_v60  ;;  %v729_v63 = vpack.c.bf16 %v707_v42, %v707_v42  ;;  %v942_v16 = vunpack.c.l.b16 %v2570_v4  ;;  %v850_v60 = vunpack.c.l.bf16 %v2506_v13  ;;  %v2157_v13 = vld [vmem:[#allocation2 + $0x90] sm:$0xff] }
 0x197   : > { %1359 = vmatpush.bf16.msrb.mxu3 %v2160_v0 }
 0x198   : > { %v862_v2 = vunpack.c.l.bf16 %v830_v30  ;;  %v750_v46 = vunpack.c.l.bf16 %v729_v63 }
 0x19a   : > { %v767_v3 = vadd.f32 %v2513_v28, %v750_v46  ;;  %v878_v23 = vadd.f32 %v862_v2, %v846_v1 }
 0x19b   : > { %1360 = vmatpush.bf16.msrb.mxu3 %v2159_v11  ;;  %v1183_v11 = vunpack.c.l.bf16 %v2532_v22 }
 0x19c   : > { %v815_v5 = vmax.f32 %v767_v3, 0.0  ;;  %v2572_v6 = vpack.c.bf16 %v878_v23, %v878_v23  ;;  %v2158_v3 = vld [vmem:[#allocation2 + $0x98] sm:$0xff]  ;;  %v2057_v23 = vld [vmem:[%s2797_s4 + $0x1] sm:$0x1] }
 0x19d   : > { %v709_v7 = vpop.f32.mrf.mxu1 }
 0x19e   : > { %v831_v14 = vpack.c.bf16 %v815_v5, %v815_v5  ;;  %v730_v35 = vpack.c.bf16 %v709_v7, %v709_v7  ;;  %v943_v18 = vunpack.c.l.b16 %v2572_v6  ;;  %v2156_v5 = vld [vmem:[#allocation2 + $0x88] sm:$0xff]  ;;  %v1080_v7 = vpack.i.b16 %v2057_v23, %v2057_v23 }
 0x19f   : > { %1361 = vmatpush.bf16.msrb.mxu3 %v2158_v3 }
 0x1a0   : > { %v751_v19 = vunpack.c.l.bf16 %v730_v35  ;;  %v953_v52 = vpack.c.b16 %v943_v18, %v942_v16  ;;  %v863_v36 = vunpack.c.l.bf16 %v831_v14  ;;  %v2155_v14 = vld [vmem:[#allocation2 + $0x80] sm:$0xff]  ;;  %v1082_v35 = vperm.slane %v1080_v7, 0 }
 0x1a2   : > { %v768_v21 = vadd.f32 %v2513_v28, %v751_v19  ;;  %1045 = vmatmul.bf16.gmra.mxu2 %v953_v52  ;;  %v879_v31 = vadd.f32 %v863_v36, %v847_v25  ;;  %v2598_v19 = vunpack.c.l.bf16 %v1082_v35 }
 0x1a3   : > { %1362 = vmatpush.bf16.msrb.mxu3 %v2157_v13 }
 0x1a4   : > { %v816_v8 = vmax.f32 %v768_v21, 0.0  ;;  %v2580_v38 = vpack.c.bf16 %v879_v31, %v879_v31  ;;  %v1180_v31 = vunpack.c.l.bf16 %v2519_v54 }
 0x1a5   : > { %v712_v53 = vpop.f32.mrf.mxu1 }
 0x1a6   : > { %v832_v26 = vpack.c.bf16 %v816_v8, %v816_v8  ;;  %v731_v29 = vpack.c.bf16 %v712_v53, %v712_v53  ;;  %v944_v47 = vunpack.c.l.b16 %v2580_v38 }
 0x1a7   : > { %1363 = vmatpush.bf16.msrb.mxu3 %v2156_v5 }
 0x1a8   : > { %v864_v12 = vunpack.c.l.bf16 %v832_v26  ;;  %v752_v33 = vunpack.c.l.bf16 %v731_v29 }
 0x1aa   : > { %v769_v34 = vadd.f32 %v2513_v28, %v752_v33  ;;  %v880_v37 = vadd.f32 %v864_v12, %v848_v32 }
 0x1ab   : > { %1364 = vmatpush.bf16.msrb.mxu3 %v2155_v14 }
 0x1ac   : > { %v817_v39 = vmax.f32 %v769_v34, 0.0  ;;  %v2582_v40 = vpack.c.bf16 %v880_v37, %v880_v37 }
 0x1ad   : > { %v714_v41 = vpop.f32.mrf.mxu1 }
 0x1ae   : > { %v833_v61 = vpack.c.bf16 %v817_v39, %v817_v39  ;;  %v732_v44 = vpack.c.bf16 %v714_v41, %v714_v41  ;;  %v945_v48 = vunpack.c.l.b16 %v2582_v40  ;;  %v1181_v39 = vunpack.c.l.bf16 %v2522_v57 }
 0x1b0   : > { %v753_v9 = vunpack.c.l.bf16 %v732_v44  ;;  %v954_v50 = vpack.c.b16 %v945_v48, %v944_v47  ;;  %v865_v62 = vunpack.c.l.bf16 %v833_v61 }
 0x1b2   : > { %v770_v55 = vadd.f32 %v2513_v28, %v753_v9  ;;  %1050 = vmatmul.bf16.gmra.mxu2 %v954_v50  ;;  %v881_v58 = vadd.f32 %v865_v62, %v849_v56 }
 0x1b4   : > { %v818_v27 = vmax.f32 %v770_v55, 0.0  ;;  %v2589_v63 = vpack.c.bf16 %v881_v58, %v881_v58 }
 0x1b6   : > { %v834_v10 = vpack.c.bf16 %v818_v27, %v818_v27  ;;  %v946_v28 = vunpack.c.l.b16 %v2589_v63 }
 0x1b8   : > { %v866_v42 = vunpack.c.l.bf16 %v834_v10 }
 0x1ba   : > { %v882_v30 = vadd.f32 %v866_v42, %v850_v60  ;;  %v1182_v60 = vunpack.c.l.bf16 %v2530_v20 }
 0x1bc   : > { %v2591_v1 = vpack.c.bf16 %v882_v30, %v882_v30 }
 0x1be   : > { %v947_v2 = vunpack.c.l.b16 %v2591_v1 }
 0x1c0   : > { %v955_v46 = vpack.c.b16 %v947_v2, %v946_v28 }
 0x1c2   : > { %1055 = vmatmul.bf16.gmra.mxu2 %v955_v46 }
 0x1d5   : > { %v1021_v16 = vpop.f32.mrf.mxu2 }
 0x1d6   : > { %v1061_v18 = vpack.c.bf16 %v1021_v16, %v1021_v16 }
 0x1d8   : > { %v1083_v52 = vunpack.c.l.bf16 %v1061_v18 }
 0x1da   : > { %v1100_v36 = vadd.f32 %v2598_v19, %v1083_v52 }
 0x1dc   : > { %v1148_v21 = vmax.f32 %v1100_v36, 0.0 }
 0x1dd   : > { %v1023_v24 = vpop.f32.mrf.mxu2 }
 0x1de   : > { %v1164_v25 = vpack.c.bf16 %v1148_v21, %v1148_v21  ;;  %v1062_v8 = vpack.c.bf16 %v1023_v24, %v1023_v24 }
 0x1e0   : > { %v1084_v53 = vunpack.c.l.bf16 %v1062_v8  ;;  %v1196_v26 = vunpack.c.l.bf16 %v1164_v25  ;;  %v1184_v25 = vunpack.c.l.bf16 %v2540_v49 }
 0x1e2   : > { %v1101_v29 = vadd.f32 %v2598_v19, %v1084_v53  ;;  %v1212_v33 = vadd.f32 %v1196_v26, %v1180_v31 }
 0x1e4   : > { %v1149_v32 = vmax.f32 %v1101_v29, 0.0  ;;  %v2604_v44 = vpack.c.bf16 %v1212_v33, %v1212_v33 }
 0x1e5   : > { %v1026_v12 = vpop.f32.mrf.mxu2 }
 0x1e6   : > { %v1165_v34 = vpack.c.bf16 %v1149_v32, %v1149_v32  ;;  %v1063_v37 = vpack.c.bf16 %v1026_v12, %v1026_v12  ;;  %v1277_v56 = vunpack.c.l.b16 %v2604_v44  ;;  %v1185_v32 = vunpack.c.l.bf16 %v2542_v51 }
 0x1e8   : > { %v1197_v41 = vunpack.c.l.bf16 %v1165_v34  ;;  %v1085_v61 = vunpack.c.l.bf16 %v1063_v37 }
 0x1ea   : > { %v1213_v47 = vadd.f32 %v1197_v41, %v1181_v39  ;;  %v1102_v48 = vadd.f32 %v2598_v19, %v1085_v61 }
 0x1ec   : > { %v2607_v9 = vpack.c.bf16 %v1213_v47, %v1213_v47  ;;  %v1150_v50 = vmax.f32 %v1102_v48, 0.0 }
 0x1ed   : > { %v1028_v62 = vpop.f32.mrf.mxu2 }
 0x1ee   : > { %v1166_v55 = vpack.c.bf16 %v1150_v50, %v1150_v50  ;;  %v1064_v54 = vpack.c.bf16 %v1028_v62, %v1028_v62  ;;  %v1278_v27 = vunpack.c.l.b16 %v2607_v9 }
 0x1f0   : > { %v1086_v10 = vunpack.c.l.bf16 %v1064_v54  ;;  %v1293_v58 = vpack.c.b16 %v1278_v27, %v1277_v56  ;;  %v1198_v57 = vunpack.c.l.bf16 %v1166_v55  ;;  %v1186_v27 = vunpack.c.l.bf16 %v2550_v15 }
 0x1f2   : > { %v1103_v59 = vadd.f32 %v2598_v19, %v1086_v10  ;;  %1365 = vmatmul.bf16.vlgmr.msrb.gmra.mxu3 %v1293_v58  ;;  %v1214_v2 = vadd.f32 %v1198_v57, %v1182_v60 }
 0x1f4   : > { %v1151_v42 = vmax.f32 %v1103_v59, 0.0  ;;  %v2615_v5 = vpack.c.bf16 %v1214_v2, %v1214_v2 }
 0x1f5   : > { %v1031_v30 = vpop.f32.mrf.mxu2 }
 0x1f6   : > { %v1167_v0 = vpack.c.bf16 %v1151_v42, %v1151_v42  ;;  %v1065_v28 = vpack.c.bf16 %v1031_v30, %v1031_v30  ;;  %v1279_v18 = vunpack.c.l.b16 %v2615_v5  ;;  %v1187_v42 = vunpack.c.l.bf16 %v2552_v17 }
 0x1f8   : > { %v1199_v46 = vunpack.c.l.bf16 %v1167_v0  ;;  %v1087_v3 = vunpack.c.l.bf16 %v1065_v28 }
 0x1fa   : > { %v1104_v13 = vadd.f32 %v2598_v19, %v1087_v3  ;;  %v1215_v23 = vadd.f32 %v1199_v46, %v1183_v11 }
 0x1fc   : > { %v1152_v7 = vmax.f32 %v1104_v13, 0.0  ;;  %v2617_v14 = vpack.c.bf16 %v1215_v23, %v1215_v23 }
 0x1fd   : > { %v1033_v35 = vpop.f32.mrf.mxu2 }
 0x1fe   : > { %v1168_v16 = vpack.c.bf16 %v1152_v7, %v1152_v7  ;;  %v1066_v20 = vpack.c.bf16 %v1033_v35, %v1033_v35  ;;  %v1280_v52 = vunpack.c.l.b16 %v2617_v14 }
 0x200   : > { %v1088_v36 = vunpack.c.l.bf16 %v1066_v20  ;;  %v1294_v21 = vpack.c.b16 %v1280_v52, %v1279_v18  ;;  %v1200_v22 = vunpack.c.l.bf16 %v1168_v16  ;;  %v1188_v52 = vunpack.c.l.bf16 %v2560_v43 }
 0x202   : > { %v1105_v24 = vadd.f32 %v2598_v19, %v1088_v36  ;;  %1370 = vmatmul.bf16.gmra.mxu3 %v1294_v21  ;;  %v1216_v31 = vadd.f32 %v1200_v22, %v1184_v25 }
 0x204   : > { %v1153_v8 = vmax.f32 %v1105_v24, 0.0  ;;  %v2625_v39 = vpack.c.bf16 %v1216_v31, %v1216_v31 }
 0x205   : > { %v1036_v53 = vpop.f32.mrf.mxu2 }
 0x206   : > { %v1169_v26 = vpack.c.bf16 %v1153_v8, %v1153_v8  ;;  %v1067_v29 = vpack.c.bf16 %v1036_v53, %v1036_v53  ;;  %v1281_v50 = vunpack.c.l.b16 %v2625_v39  ;;  %v1189_v8 = vunpack.c.l.bf16 %v2562_v45 }
 0x208   : > { %v1201_v12 = vunpack.c.l.bf16 %v1169_v26  ;;  %v1089_v33 = vunpack.c.l.bf16 %v1067_v29 }
 0x20a   : > { %v1106_v34 = vadd.f32 %v2598_v19, %v1089_v33  ;;  %v1217_v37 = vadd.f32 %v1201_v12, %v1185_v32 }
 0x20c   : > { %v1154_v41 = vmax.f32 %v1106_v34, 0.0  ;;  %v2627_v61 = vpack.c.bf16 %v1217_v37, %v1217_v37 }
 0x20d   : > { %v1038_v47 = vpop.f32.mrf.mxu2 }
 0x20e   : > { %v1170_v48 = vpack.c.bf16 %v1154_v41, %v1154_v41  ;;  %v1068_v49 = vpack.c.bf16 %v1038_v47, %v1038_v47  ;;  %v1282_v62 = vunpack.c.l.b16 %v2627_v61 }
 0x210   : > { %v1090_v55 = vunpack.c.l.bf16 %v1068_v49  ;;  %v1295_v54 = vpack.c.b16 %v1282_v62, %v1281_v50  ;;  %v1202_v51 = vunpack.c.l.bf16 %v1170_v48  ;;  %v1190_v62 = vunpack.c.l.bf16 %v2570_v4 }
 0x212   : > { %v1107_v56 = vadd.f32 %v2598_v19, %v1090_v55  ;;  %1375 = vmatmul.bf16.gmra.mxu3 %v1295_v54  ;;  %v1218_v60 = vadd.f32 %v1202_v51, %v1186_v27 }
 0x214   : > { %v1155_v10 = vmax.f32 %v1107_v56, 0.0  ;;  %v2635_v11 = vpack.c.bf16 %v1218_v60, %v1218_v60 }
 0x215   : > { %v1041_v58 = vpop.f32.mrf.mxu2 }
 0x216   : > { %v1171_v57 = vpack.c.bf16 %v1155_v10, %v1155_v10  ;;  %v1069_v59 = vpack.c.bf16 %v1041_v58, %v1041_v58  ;;  %v1283_v7 = vunpack.c.l.b16 %v2635_v11  ;;  %v1191_v10 = vunpack.c.l.bf16 %v2572_v6 }
 0x218   : > { %v1203_v30 = vunpack.c.l.bf16 %v1171_v57  ;;  %v1091_v0 = vunpack.c.l.bf16 %v1069_v59 }
 0x21a   : > { %v1108_v28 = vadd.f32 %v2598_v19, %v1091_v0  ;;  %v1219_v2 = vadd.f32 %v1203_v30, %v1187_v42 }
 0x21c   : > { %v1156_v46 = vmax.f32 %v1108_v28, 0.0  ;;  %v2637_v3 = vpack.c.bf16 %v1219_v2, %v1219_v2 }
 0x21d   : > { %v1043_v13 = vpop.f32.mrf.mxu2 }
 0x21e   : > { %v1172_v23 = vpack.c.bf16 %v1156_v46, %v1156_v46  ;;  %v1070_v15 = vpack.c.bf16 %v1043_v13, %v1043_v13  ;;  %v1284_v35 = vunpack.c.l.b16 %v2637_v3 }
 0x220   : > { %v1092_v16 = vunpack.c.l.bf16 %v1070_v15  ;;  %v1296_v20 = vpack.c.b16 %v1284_v35, %v1283_v7  ;;  %v1204_v17 = vunpack.c.l.bf16 %v1172_v23  ;;  %v2170_v35 = vld [vmem:[#allocation2 + $0xf8] sm:$0xff] }
 0x221   : > { %1646 = vmatpush.bf16.msrb.mxu0 %v2170_v35 }
 0x222   : > { %v1109_v18 = vadd.f32 %v2598_v19, %v1092_v16  ;;  %1380 = vmatmul.bf16.gmra.mxu3 %v1296_v20  ;;  %v1220_v25 = vadd.f32 %v1204_v17, %v1188_v52  ;;  %v1192_v16 = vunpack.c.l.bf16 %v2580_v38  ;;  %v2169_v17 = vld [vmem:[#allocation2 + $0xf0] sm:$0xff] }
 0x224   : > { %v1157_v36 = vmax.f32 %v1109_v18, 0.0  ;;  %v2645_v32 = vpack.c.bf16 %v1220_v25, %v1220_v25 }
 0x225   : > { %v1046_v21 = vpop.f32.mrf.mxu2  ;;  %1647 = vmatpush.bf16.msrb.mxu0 %v2169_v17 }
 0x226   : > { %v1173_v22 = vpack.c.bf16 %v1157_v36, %v1157_v36  ;;  %v1071_v24 = vpack.c.bf16 %v1046_v21, %v1046_v21  ;;  %v1285_v41 = vunpack.c.l.b16 %v2645_v32 }
 0x228   : > { %v1205_v53 = vunpack.c.l.bf16 %v1173_v22  ;;  %v1093_v26 = vunpack.c.l.bf16 %v1071_v24  ;;  %v1193_v22 = vunpack.c.l.bf16 %v2582_v40 }
 0x22a   : > { %v1110_v29 = vadd.f32 %v2598_v19, %v1093_v26  ;;  %v1221_v31 = vadd.f32 %v1205_v53, %v1189_v8 }
 0x22c   : > { %v1158_v12 = vmax.f32 %v1110_v29, 0.0  ;;  %v2647_v33 = vpack.c.bf16 %v1221_v31, %v1221_v31 }
 0x22d   : > { %v1048_v34 = vpop.f32.mrf.mxu2 }
 0x22e   : > { %v1174_v37 = vpack.c.bf16 %v1158_v12, %v1158_v12  ;;  %v1072_v43 = vpack.c.bf16 %v1048_v34, %v1048_v34  ;;  %v1286_v47 = vunpack.c.l.b16 %v2647_v33 }
 0x230   : > { %v1094_v48 = vunpack.c.l.bf16 %v1072_v43  ;;  %v1297_v49 = vpack.c.b16 %v1286_v47, %v1285_v41  ;;  %v1206_v45 = vunpack.c.l.bf16 %v1174_v37 }
 0x232   : > { %v1111_v50 = vadd.f32 %v2598_v19, %v1094_v48  ;;  %1385 = vmatmul.bf16.gmra.mxu3 %v1297_v49  ;;  %v1222_v27 = vadd.f32 %v1206_v45, %v1190_v62  ;;  %v1194_v49 = vunpack.c.l.bf16 %v2589_v63  ;;  %v2166_v63 = vld [vmem:[#allocation2 + $0xd8] sm:$0xff] }
 0x234   : > { %v1159_v55 = vmax.f32 %v1111_v50, 0.0  ;;  %v2655_v42 = vpack.c.bf16 %v1222_v27, %v1222_v27 }
 0x235   : > { %v1051_v54 = vpop.f32.mrf.mxu2 }
 0x236   : > { %v1175_v51 = vpack.c.bf16 %v1159_v55, %v1159_v55  ;;  %v1073_v56 = vpack.c.bf16 %v1051_v54, %v1051_v54  ;;  %v1287_v46 = vunpack.c.l.b16 %v2655_v42  ;;  %v2168_v55 = vld [vmem:[#allocation2 + $0xe8] sm:$0xff]  ;;  %v1195_v54 = vunpack.c.l.bf16 %v2591_v1 }
 0x237   : > { %1648 = vmatpush.bf16.msrb.mxu0 %v2168_v55  ;;  %v2164_v1 = vld [vmem:[#allocation2 + $0xc8] sm:$0xff] }
 0x238   : > { %v1207_v58 = vunpack.c.l.bf16 %v1175_v51  ;;  %v1095_v57 = vunpack.c.l.bf16 %v1073_v56 }
 0x23a   : > { %v1112_v59 = vadd.f32 %v2598_v19, %v1095_v57  ;;  %v1223_v60 = vadd.f32 %v1207_v58, %v1191_v10  ;;  %v2167_v10 = vld [vmem:[#allocation2 + $0xe0] sm:$0xff] }
 0x23b   : > { %1649 = vmatpush.bf16.msrb.mxu0 %v2167_v10 }
 0x23c   : > { %v1160_v30 = vmax.f32 %v1112_v59, 0.0  ;;  %v2657_v0 = vpack.c.bf16 %v1223_v60, %v1223_v60  ;;  %v2165_v60 = vld [vmem:[#allocation2 + $0xd0] sm:$0xff] }
 0x23d   : > { %v1053_v28 = vpop.f32.mrf.mxu2 }
 0x23e   : > { %v1176_v2 = vpack.c.bf16 %v1160_v30, %v1160_v30  ;;  %v1074_v4 = vpack.c.bf16 %v1053_v28, %v1053_v28  ;;  %v1288_v13 = vunpack.c.l.b16 %v2657_v0  ;;  %v2090_v30 = vld [vmem:[%s2797_s4 + $0x2] sm:$0x1] }
 0x23f   : > { %1650 = vmatpush.bf16.msrb.mxu0 %v2166_v63  ;;  %v2163_v28 = vld [vmem:[#allocation2 + $0xc0] sm:$0xff] }
 0x240   : > { %v1096_v23 = vunpack.c.l.bf16 %v1074_v4  ;;  %v1298_v15 = vpack.c.b16 %v1288_v13, %v1287_v46  ;;  %v1208_v6 = vunpack.c.l.bf16 %v1176_v2  ;;  %v1425_v2 = vpack.i.b16 %v2090_v30, %v2090_v30 }
 0x242   : > { %v1113_v7 = vadd.f32 %v2598_v19, %v1096_v23  ;;  %1390 = vmatmul.bf16.gmra.mxu3 %v1298_v15  ;;  %v1224_v21 = vadd.f32 %v1208_v6, %v1192_v16  ;;  %v1427_v4 = vperm.slane %v1425_v2, 0 }
 0x243   : > { %1651 = vmatpush.bf16.msrb.mxu0 %v2165_v60 }
 0x244   : > { %v1161_v20 = vmax.f32 %v1113_v7, 0.0  ;;  %v2665_v26 = vpack.c.bf16 %v1224_v21, %v1224_v21  ;;  %v2683_v23 = vunpack.c.l.bf16 %v1427_v4 }
 0x245   : > { %v1056_v18 = vpop.f32.mrf.mxu2 }
 0x246   : > { %v1177_v52 = vpack.c.bf16 %v1161_v20, %v1161_v20  ;;  %v1075_v36 = vpack.c.bf16 %v1056_v18, %v1056_v18  ;;  %v1289_v37 = vunpack.c.l.b16 %v2665_v26 }
 0x247   : > { %1652 = vmatpush.bf16.msrb.mxu0 %v2164_v1 }
 0x248   : > { %v1209_v24 = vunpack.c.l.bf16 %v1177_v52  ;;  %v1097_v25 = vunpack.c.l.bf16 %v1075_v36 }
 0x24a   : > { %v1114_v8 = vadd.f32 %v2598_v19, %v1097_v25  ;;  %v1225_v53 = vadd.f32 %v1209_v24, %v1193_v22 }
 0x24b   : > { %1653 = vmatpush.bf16.msrb.mxu0 %v2163_v28 }
 0x24c   : > { %v1162_v29 = vmax.f32 %v1114_v8, 0.0  ;;  %v2667_v31 = vpack.c.bf16 %v1225_v53, %v1225_v53  ;;  %v1525_v53 = vunpack.c.l.bf16 %v2604_v44 }
 0x24d   : > { %v1058_v38 = vpop.f32.mrf.mxu2 }
 0x24e   : > { %v1178_v12 = vpack.c.bf16 %v1162_v29, %v1162_v29  ;;  %v1076_v34 = vpack.c.bf16 %v1058_v38, %v1058_v38  ;;  %v1290_v43 = vunpack.c.l.b16 %v2667_v31  ;;  %v1526_v29 = vunpack.c.l.bf16 %v2607_v9 }
 0x250   : > { %v1098_v41 = vunpack.c.l.bf16 %v1076_v34  ;;  %v1299_v40 = vpack.c.b16 %v1290_v43, %v1289_v37  ;;  %v1210_v47 = vunpack.c.l.bf16 %v1178_v12 }
 0x252   : > { %v1115_v48 = vadd.f32 %v2598_v19, %v1098_v41  ;;  %1395 = vmatmul.bf16.gmra.mxu3 %v1299_v40  ;;  %v1226_v62 = vadd.f32 %v1210_v47, %v1194_v49 }
 0x254   : > { %v1163_v45 = vmax.f32 %v1115_v48, 0.0  ;;  %v2674_v27 = vpack.c.bf16 %v1226_v62, %v1226_v62 }
 0x256   : > { %v1179_v50 = vpack.c.bf16 %v1163_v45, %v1163_v45  ;;  %v1291_v19 = vunpack.c.l.b16 %v2674_v27 }
 0x258   : > { %v1211_v51 = vunpack.c.l.bf16 %v1179_v50 }
 0x25a   : > { %v1227_v56 = vadd.f32 %v1211_v51, %v1195_v54  ;;  %v1527_v51 = vunpack.c.l.bf16 %v2615_v5 }
 0x25c   : > { %v2676_v58 = vpack.c.bf16 %v1227_v56, %v1227_v56  ;;  %v1528_v56 = vunpack.c.l.bf16 %v2617_v14 }
 0x25e   : > { %v1292_v57 = vunpack.c.l.b16 %v2676_v58 }
 0x260   : > { %v1300_v59 = vpack.c.b16 %v1292_v57, %v1291_v19 }
 0x262   : > { %1400 = vmatmul.bf16.gmra.mxu3 %v1300_v59 }
 0x275   : > { %v1366_v46 = vpop.f32.mrf.mxu3 }
 0x276   : > { %v1406_v13 = vpack.c.bf16 %v1366_v46, %v1366_v46 }
 0x278   : > { %v1428_v15 = vunpack.c.l.bf16 %v1406_v13 }
 0x27a   : > { %v1445_v6 = vadd.f32 %v2683_v23, %v1428_v15 }
 0x27c   : > { %v1493_v35 = vmax.f32 %v1445_v6, 0.0 }
 0x27d   : > { %v1368_v7 = vpop.f32.mrf.mxu3 }
 0x27e   : > { %v1407_v16 = vpack.c.bf16 %v1368_v7, %v1368_v7  ;;  %v1509_v17 = vpack.c.bf16 %v1493_v35, %v1493_v35  ;;  %v1529_v7 = vunpack.c.l.bf16 %v2625_v39  ;;  %v1530_v35 = vunpack.c.l.bf16 %v2627_v61 }
 0x280   : > { %v1429_v20 = vunpack.c.l.bf16 %v1407_v16  ;;  %v1541_v21 = vunpack.c.l.bf16 %v1509_v17 }
 0x282   : > { %v1446_v18 = vadd.f32 %v2683_v23, %v1429_v20  ;;  %v1557_v12 = vadd.f32 %v1541_v21, %v1525_v53 }
 0x284   : > { %v1494_v52 = vmax.f32 %v1446_v18, 0.0 }
 0x285   : > { %v1371_v36 = vpop.f32.mrf.mxu3 }
 0x286   : > { %v1510_v22 = vpack.c.bf16 %v1494_v52, %v1494_v52  ;;  %v1408_v24 = vpack.c.bf16 %v1371_v36, %v1371_v36 }
 0x288   : > { %v1542_v25 = vunpack.c.l.bf16 %v1510_v22  ;;  %v1430_v8 = vunpack.c.l.bf16 %v1408_v24 }
 0x28a   : > { %v1447_v38 = vadd.f32 %v2683_v23, %v1430_v8  ;;  %v1558_v34 = vadd.f32 %v1542_v25, %v1526_v29 }
 0x28c   : > { %v1573_v37 = vpack.c.bf16 %v1558_v34, %v1557_v12  ;;  %v1495_v41 = vmax.f32 %v1447_v38, 0.0  ;;  %v1531_v34 = vunpack.c.l.bf16 %v2635_v11 }
 0x28d   : > { %v1373_v43 = vpop.f32.mrf.mxu3 }
 0x28e   : > { %v1409_v40 = vpack.c.bf16 %v1373_v43, %v1373_v43  ;;  %1654 = vmatmul.bf16.vlgmr.msrb.gmra.mxu0 %v1573_v37  ;;  %v1511_v48 = vpack.c.bf16 %v1495_v41, %v1495_v41  ;;  %v1532_v37 = vunpack.c.l.bf16 %v2637_v3 }
 0x290   : > { %v1431_v47 = vunpack.c.l.bf16 %v1409_v40  ;;  %v1543_v62 = vunpack.c.l.bf16 %v1511_v48 }
 0x292   : > { %v1448_v49 = vadd.f32 %v2683_v23, %v1431_v47  ;;  %v1559_v19 = vadd.f32 %v1543_v62, %v1527_v51 }
 0x294   : > { %v1496_v45 = vmax.f32 %v1448_v49, 0.0 }
 0x295   : > { %v1376_v50 = vpop.f32.mrf.mxu3 }
 0x296   : > { %v1512_v55 = vpack.c.bf16 %v1496_v45, %v1496_v45  ;;  %v1410_v44 = vpack.c.bf16 %v1376_v50, %v1376_v50 }
 0x298   : > { %v1544_v54 = vunpack.c.l.bf16 %v1512_v55  ;;  %v1432_v9 = vunpack.c.l.bf16 %v1410_v44 }
 0x29a   : > { %v1449_v10 = vadd.f32 %v2683_v23, %v1432_v9  ;;  %v1560_v57 = vadd.f32 %v1544_v54, %v1528_v56 }
 0x29c   : > { %v1574_v63 = vpack.c.bf16 %v1560_v57, %v1559_v19  ;;  %v1497_v60 = vmax.f32 %v1449_v10, 0.0  ;;  %v1533_v10 = vunpack.c.l.bf16 %v2645_v32  ;;  %v1534_v19 = vunpack.c.l.bf16 %v2647_v33 }
 0x29d   : > { %v1378_v59 = vpop.f32.mrf.mxu3 }
 0x29e   : > { %v1411_v1 = vpack.c.bf16 %v1378_v59, %v1378_v59  ;;  %1659 = vmatmul.bf16.gmra.mxu0 %v1574_v63  ;;  %v1513_v28 = vpack.c.bf16 %v1497_v60, %v1497_v60 }
 0x2a0   : > { %v1433_v30 = vunpack.c.l.bf16 %v1411_v1  ;;  %v1545_v13 = vunpack.c.l.bf16 %v1513_v28 }
 0x2a2   : > { %v1450_v2 = vadd.f32 %v2683_v23, %v1433_v30  ;;  %v1561_v20 = vadd.f32 %v1545_v13, %v1529_v7  ;;  %v1535_v7 = vunpack.c.l.bf16 %v2655_v42 }
 0x2a4   : > { %v1498_v4 = vmax.f32 %v1450_v2, 0.0 }
 0x2a5   : > { %v1381_v46 = vpop.f32.mrf.mxu3 }
 0x2a6   : > { %v1514_v15 = vpack.c.bf16 %v1498_v4, %v1498_v4  ;;  %v1412_v5 = vpack.c.bf16 %v1381_v46, %v1381_v46 }
 0x2a8   : > { %v1546_v6 = vunpack.c.l.bf16 %v1514_v15  ;;  %v1434_v14 = vunpack.c.l.bf16 %v1412_v5 }
 0x2aa   : > { %v1451_v16 = vadd.f32 %v2683_v23, %v1434_v14  ;;  %v1562_v17 = vadd.f32 %v1546_v6, %v1530_v35  ;;  %v1536_v35 = vunpack.c.l.bf16 %v2657_v0 }
 0x2ac   : > { %v1575_v18 = vpack.c.bf16 %v1562_v17, %v1561_v20  ;;  %v1499_v36 = vmax.f32 %v1451_v16, 0.0 }
 0x2ad   : > { %v1383_v52 = vpop.f32.mrf.mxu3 }
 0x2ae   : > { %v1413_v21 = vpack.c.bf16 %v1383_v52, %v1383_v52  ;;  %1664 = vmatmul.bf16.gmra.mxu0 %v1575_v18  ;;  %v1515_v24 = vpack.c.bf16 %v1499_v36, %v1499_v36 }
 0x2b0   : > { %v1435_v22 = vunpack.c.l.bf16 %v1413_v21  ;;  %v1547_v29 = vunpack.c.l.bf16 %v1515_v24 }
 0x2b2   : > { %v1452_v25 = vadd.f32 %v2683_v23, %v1435_v22  ;;  %v1563_v41 = vadd.f32 %v1547_v29, %v1531_v34 }
 0x2b4   : > { %v1500_v8 = vmax.f32 %v1452_v25, 0.0 }
 0x2b5   : > { %v1386_v53 = vpop.f32.mrf.mxu3 }
 0x2b6   : > { %v1516_v38 = vpack.c.bf16 %v1500_v8, %v1500_v8  ;;  %v1414_v39 = vpack.c.bf16 %v1386_v53, %v1386_v53 }
 0x2b8   : > { %v1548_v12 = vunpack.c.l.bf16 %v1516_v38  ;;  %v1436_v61 = vunpack.c.l.bf16 %v1414_v39 }
 0x2ba   : > { %v1453_v43 = vadd.f32 %v2683_v23, %v1436_v61  ;;  %v1564_v40 = vadd.f32 %v1548_v12, %v1532_v37  ;;  %v1537_v12 = vunpack.c.l.bf16 %v2665_v26  ;;  %v1538_v61 = vunpack.c.l.bf16 %v2667_v31 }
 0x2bb   : > { %v1539_v31 = vunpack.c.l.bf16 %v2674_v27 }
 0x2bc   : > { %v1576_v47 = vpack.c.bf16 %v1564_v40, %v1563_v41  ;;  %v1501_v49 = vmax.f32 %v1453_v43, 0.0 }
 0x2bd   : > { %v1388_v48 = vpop.f32.mrf.mxu3 }
 0x2be   : > { %v1415_v45 = vpack.c.bf16 %v1388_v48, %v1388_v48  ;;  %1669 = vmatmul.bf16.gmra.mxu0 %v1576_v47  ;;  %v1517_v62 = vpack.c.bf16 %v1501_v49, %v1501_v49 }
 0x2c0   : > { %v1437_v50 = vunpack.c.l.bf16 %v1415_v45  ;;  %v1549_v9 = vunpack.c.l.bf16 %v1517_v62 }
 0x2c2   : > { %v1454_v55 = vadd.f32 %v2683_v23, %v1437_v50  ;;  %v1565_v63 = vadd.f32 %v1549_v9, %v1533_v10 }
 0x2c4   : > { %v1502_v44 = vmax.f32 %v1454_v55, 0.0 }
 0x2c5   : > { %v1391_v54 = vpop.f32.mrf.mxu3 }
 0x2c6   : > { %v1518_v51 = vpack.c.bf16 %v1502_v44, %v1502_v44  ;;  %v1416_v11 = vpack.c.bf16 %v1391_v54, %v1391_v54  ;;  %v1540_v54 = vunpack.c.l.bf16 %v2676_v58 }
 0x2c8   : > { %v1550_v56 = vunpack.c.l.bf16 %v1518_v51  ;;  %v1438_v3 = vunpack.c.l.bf16 %v1416_v11 }
 0x2ca   : > { %v1455_v57 = vadd.f32 %v2683_v23, %v1438_v3  ;;  %v1566_v59 = vadd.f32 %v1550_v56, %v1534_v19  ;;  %v2123_v56 = vld [vmem:[%s2797_s4 + $0x3] sm:$0x1] }
 0x2cb   : > { %v1714_v3 = vpack.i.b16 %v2123_v56, %v2123_v56 }
 0x2cc   : > { %v1577_v60 = vpack.c.bf16 %v1566_v59, %v1565_v63  ;;  %v1503_v30 = vmax.f32 %v1455_v57, 0.0 }
 0x2cd   : > { %v1393_v1 = vpop.f32.mrf.mxu3 }
 0x2ce   : > { %v1417_v28 = vpack.c.bf16 %v1393_v1, %v1393_v1  ;;  %1674 = vmatmul.bf16.gmra.mxu0 %v1577_v60  ;;  %v1519_v4 = vpack.c.bf16 %v1503_v30, %v1503_v30 }
 0x2d0   : > { %v1439_v2 = vunpack.c.l.bf16 %v1417_v28  ;;  %v1551_v5 = vunpack.c.l.bf16 %v1519_v4 }
 0x2d2   : > { %v1456_v46 = vadd.f32 %v2683_v23, %v1439_v2  ;;  %v1567_v20 = vadd.f32 %v1551_v5, %v1535_v7 }
 0x2d4   : > { %v1504_v13 = vmax.f32 %v1456_v46, 0.0 }
 0x2d5   : > { %v1396_v15 = vpop.f32.mrf.mxu3 }
 0x2d6   : > { %v1520_v6 = vpack.c.bf16 %v1504_v13, %v1504_v13  ;;  %v1418_v32 = vpack.c.bf16 %v1396_v15, %v1396_v15 }
 0x2d8   : > { %v1552_v14 = vunpack.c.l.bf16 %v1520_v6  ;;  %v1440_v33 = vunpack.c.l.bf16 %v1418_v32 }
 0x2da   : > { %v1457_v16 = vadd.f32 %v2683_v23, %v1440_v33  ;;  %v1568_v17 = vadd.f32 %v1552_v14, %v1536_v35 }
 0x2dc   : > { %v1578_v18 = vpack.c.bf16 %v1568_v17, %v1567_v20  ;;  %v1505_v36 = vmax.f32 %v1457_v16, 0.0 }
 0x2dd   : > { %v1398_v52 = vpop.f32.mrf.mxu3 }
 0x2de   : > { %v1419_v21 = vpack.c.bf16 %v1398_v52, %v1398_v52  ;;  %1679 = vmatmul.bf16.gmra.mxu0 %v1578_v18  ;;  %v1521_v24 = vpack.c.bf16 %v1505_v36, %v1505_v36 }
 0x2e0   : > { %v1441_v22 = vunpack.c.l.bf16 %v1419_v21  ;;  %v1553_v29 = vunpack.c.l.bf16 %v1521_v24 }
 0x2e2   : > { %v1458_v25 = vadd.f32 %v2683_v23, %v1441_v22  ;;  %v1569_v37 = vadd.f32 %v1553_v29, %v1537_v12 }
 0x2e4   : > { %v1506_v8 = vmax.f32 %v1458_v25, 0.0 }
 0x2e5   : > { %v1401_v53 = vpop.f32.mrf.mxu3 }
 0x2e6   : > { %v1522_v38 = vpack.c.bf16 %v1506_v8, %v1506_v8  ;;  %v1420_v42 = vpack.c.bf16 %v1401_v53, %v1401_v53 }
 0x2e8   : > { %v1554_v39 = vunpack.c.l.bf16 %v1522_v38  ;;  %v1442_v0 = vunpack.c.l.bf16 %v1420_v42 }
 0x2ea   : > { %v1459_v34 = vadd.f32 %v2683_v23, %v1442_v0  ;;  %v1570_v43 = vadd.f32 %v1554_v39, %v1538_v61 }
 0x2ec   : > { %v1579_v41 = vpack.c.bf16 %v1570_v43, %v1569_v37  ;;  %v1507_v47 = vmax.f32 %v1459_v34, 0.0 }
 0x2ed   : > { %v1403_v40 = vpop.f32.mrf.mxu3 }
 0x2ee   : > { %v1421_v48 = vpack.c.bf16 %v1403_v40, %v1403_v40  ;;  %1684 = vmatmul.bf16.gmra.mxu0 %v1579_v41  ;;  %v1523_v45 = vpack.c.bf16 %v1507_v47, %v1507_v47 }
 0x2f0   : > { %v1443_v49 = vunpack.c.l.bf16 %v1421_v48  ;;  %v1555_v55 = vunpack.c.l.bf16 %v1523_v45 }
 0x2f2   : > { %v1460_v50 = vadd.f32 %v2683_v23, %v1443_v49  ;;  %v1571_v9 = vadd.f32 %v1555_v55, %v1539_v31  ;;  %v1716_v23 = vperm.slane %v1714_v3, 0 }
 0x2f4   : > { %v1508_v62 = vmax.f32 %v1460_v50, 0.0  ;;  %v2720_v57 = vunpack.c.l.bf16 %v1716_v23 }
 0x2f6   : > { %v1524_v44 = vpack.c.bf16 %v1508_v62, %v1508_v62 }
 0x2f8   : > { %v1556_v26 = vunpack.c.l.bf16 %v1524_v44 }
 0x2fa   : > { %v1572_v51 = vadd.f32 %v1556_v26, %v1540_v54 }
 0x2fc   : > { %v1580_v11 = vpack.c.bf16 %v1572_v51, %v1571_v9 }
 0x2fe   : > { %1689 = vmatmul.bf16.gmra.mxu0 %v1580_v11 }
 0x30b   : > { %v1655_v10 = vpop.f32.mrf.mxu0 }
 0x30c   : > { %v1695_v19 = vpack.c.bf16 %v1655_v10, %v1655_v10 }
 0x30e   : > { %v1717_v63 = vunpack.c.l.bf16 %v1695_v19 }
 0x310   : > { %v1734_v27 = vadd.f32 %v2720_v57, %v1717_v63 }
 0x312   : > { %v1782_v58 = vmax.f32 %v1734_v27, 0.0 }
 0x313   : > { %v1657_v59 = vpop.f32.mrf.mxu0 }
 0x314   : > { %v1798_v60 = vpack.c.bf16 %v1782_v58, %v1782_v58  ;;  %v1696_v1 = vpack.c.bf16 %v1657_v59, %v1657_v59 }
 0x316   : > { %v1814_v30 = vunpack.c.l.bf16 %v1798_v60  ;;  %v1718_v28 = vunpack.c.l.bf16 %v1696_v1 }
 0x318   : > { %1830 = vst [vmem:[%s2726_s17] sm:$0xff] %v1814_v30  ;;  %v1735_v2 = vadd.f32 %v2720_v57, %v1718_v28 }
 0x31a   : > { %v1783_v4 = vmax.f32 %v1735_v2, 0.0 }
 0x31b   : > { %v1660_v46 = vpop.f32.mrf.mxu0 }
 0x31c   : > { %v1799_v13 = vpack.c.bf16 %v1783_v4, %v1783_v4  ;;  %v1697_v15 = vpack.c.bf16 %v1660_v46, %v1660_v46 }
 0x31e   : > { %v1815_v5 = vunpack.c.l.bf16 %v1799_v13  ;;  %v1719_v6 = vunpack.c.l.bf16 %v1697_v15 }
 0x320   : > { %1831 = vst [vmem:[%s2726_s17 + $0x8] sm:$0xff] %v1815_v5  ;;  %v1736_v32 = vadd.f32 %v2720_v57, %v1719_v6 }
 0x322   : > { %v1784_v14 = vmax.f32 %v1736_v32, 0.0 }
 0x323   : > { %v1662_v33 = vpop.f32.mrf.mxu0 }
 0x324   : > { %v1800_v7 = vpack.c.bf16 %v1784_v14, %v1784_v14  ;;  %v1698_v35 = vpack.c.bf16 %v1662_v33, %v1662_v33 }
 0x326   : > { %v1816_v16 = vunpack.c.l.bf16 %v1800_v7  ;;  %v1720_v20 = vunpack.c.l.bf16 %v1698_v35 }
 0x328   : > { %1832 = vst [vmem:[%s2726_s17 + $0x10] sm:$0xff] %v1816_v16  ;;  %v1737_v17 = vadd.f32 %v2720_v57, %v1720_v20 }
 0x32a   : > { %v1785_v18 = vmax.f32 %v1737_v17, 0.0 }
 0x32b   : > { %v1665_v52 = vpop.f32.mrf.mxu0 }
 0x32c   : > { %v1801_v36 = vpack.c.bf16 %v1785_v18, %v1785_v18  ;;  %v1699_v21 = vpack.c.bf16 %v1665_v52, %v1665_v52 }
 0x32e   : > { %v1817_v22 = vunpack.c.l.bf16 %v1801_v36  ;;  %v1721_v24 = vunpack.c.l.bf16 %v1699_v21 }
 0x330   : > { %1833 = vst [vmem:[%s2726_s17 + $0x18] sm:$0xff] %v1817_v22  ;;  %v1738_v25 = vadd.f32 %v2720_v57, %v1721_v24 }
 0x332   : > { %v1786_v8 = vmax.f32 %v1738_v25, 0.0 }
 0x333   : > { %v1667_v53 = vpop.f32.mrf.mxu0 }
 0x334   : > { %v1802_v29 = vpack.c.bf16 %v1786_v8, %v1786_v8  ;;  %v1700_v38 = vpack.c.bf16 %v1667_v53, %v1667_v53 }
 0x336   : > { %v1818_v42 = vunpack.c.l.bf16 %v1802_v29  ;;  %v1722_v39 = vunpack.c.l.bf16 %v1700_v38 }
 0x338   : > { %1834 = vst [vmem:[%s2726_s17 + $0x20] sm:$0xff] %v1818_v42  ;;  %v1739_v0 = vadd.f32 %v2720_v57, %v1722_v39 }
 0x33a   : > { %v1787_v12 = vmax.f32 %v1739_v0, 0.0 }
 0x33b   : > { %v1670_v61 = vpop.f32.mrf.mxu0 }
 0x33c   : > { %v1803_v34 = vpack.c.bf16 %v1787_v12, %v1787_v12  ;;  %v1701_v37 = vpack.c.bf16 %v1670_v61, %v1670_v61 }
 0x33e   : > { %v1819_v43 = vunpack.c.l.bf16 %v1803_v34  ;;  %v1723_v41 = vunpack.c.l.bf16 %v1701_v37 }
 0x340   : > { %1835 = vst [vmem:[%s2726_s17 + $0x28] sm:$0xff] %v1819_v43  ;;  %v1740_v40 = vadd.f32 %v2720_v57, %v1723_v41 }
 0x342   : > { %v1788_v47 = vmax.f32 %v1740_v40, 0.0 }
 0x343   : > { %v1672_v48 = vpop.f32.mrf.mxu0 }
 0x344   : > { %v1804_v49 = vpack.c.bf16 %v1788_v47, %v1788_v47  ;;  %v1702_v45 = vpack.c.bf16 %v1672_v48, %v1672_v48 }
 0x346   : > { %v1820_v50 = vunpack.c.l.bf16 %v1804_v49  ;;  %v1724_v62 = vunpack.c.l.bf16 %v1702_v45 }
 0x348   : > { %1836 = vst [vmem:[%s2726_s17 + $0x30] sm:$0xff] %v1820_v50  ;;  %v1741_v55 = vadd.f32 %v2720_v57, %v1724_v62 }
 0x34a   : > { %v1789_v44 = vmax.f32 %v1741_v55, 0.0 }
 0x34b   : > { %v1675_v26 = vpop.f32.mrf.mxu0 }
 0x34c   : > { %v1805_v31 = vpack.c.bf16 %v1789_v44, %v1789_v44  ;;  %v1703_v54 = vpack.c.bf16 %v1675_v26, %v1675_v26 }
 0x34e   : > { %v1821_v9 = vunpack.c.l.bf16 %v1805_v31  ;;  %v1725_v51 = vunpack.c.l.bf16 %v1703_v54 }
 0x350   : > { %1837 = vst [vmem:[%s2726_s17 + $0x38] sm:$0xff] %v1821_v9  ;;  %v1742_v11 = vadd.f32 %v2720_v57, %v1725_v51 }
 0x352   : > { %v1790_v56 = vmax.f32 %v1742_v11, 0.0 }
 0x353   : > { %v1677_v3 = vpop.f32.mrf.mxu0 }
 0x354   : > { %v1806_v23 = vpack.c.bf16 %v1790_v56, %v1790_v56  ;;  %v1704_v10 = vpack.c.bf16 %v1677_v3, %v1677_v3 }
 0x356   : > { %v1822_v19 = vunpack.c.l.bf16 %v1806_v23  ;;  %v1726_v63 = vunpack.c.l.bf16 %v1704_v10 }
 0x358   : > { %1838 = vst [vmem:[%s2726_s17 + $0x40] sm:$0xff] %v1822_v19  ;;  %v1743_v27 = vadd.f32 %v2720_v57, %v1726_v63 }
 0x35a   : > { %v1791_v58 = vmax.f32 %v1743_v27, 0.0 }
 0x35b   : > { %v1680_v59 = vpop.f32.mrf.mxu0 }
 0x35c   : > { %v1807_v60 = vpack.c.bf16 %v1791_v58, %v1791_v58  ;;  %v1705_v1 = vpack.c.bf16 %v1680_v59, %v1680_v59 }
 0x35e   : > { %v1823_v30 = vunpack.c.l.bf16 %v1807_v60  ;;  %v1727_v28 = vunpack.c.l.bf16 %v1705_v1 }
 0x360   : > { %1839 = vst [vmem:[%s2726_s17 + $0x48] sm:$0xff] %v1823_v30  ;;  %v1744_v2 = vadd.f32 %v2720_v57, %v1727_v28 }
 0x362   : > { %v1792_v4 = vmax.f32 %v1744_v2, 0.0 }
 0x363   : > { %v1682_v46 = vpop.f32.mrf.mxu0 }
 0x364   : > { %v1808_v13 = vpack.c.bf16 %v1792_v4, %v1792_v4  ;;  %v1706_v15 = vpack.c.bf16 %v1682_v46, %v1682_v46 }
 0x366   : > { %v1824_v5 = vunpack.c.l.bf16 %v1808_v13  ;;  %v1728_v6 = vunpack.c.l.bf16 %v1706_v15 }
 0x368   : > { %1840 = vst [vmem:[%s2726_s17 + $0x50] sm:$0xff] %v1824_v5  ;;  %v1745_v32 = vadd.f32 %v2720_v57, %v1728_v6 }
 0x36a   : > { %v1793_v14 = vmax.f32 %v1745_v32, 0.0 }
 0x36b   : > { %v1685_v33 = vpop.f32.mrf.mxu0 }
 0x36c   : > { %v1809_v7 = vpack.c.bf16 %v1793_v14, %v1793_v14  ;;  %v1707_v35 = vpack.c.bf16 %v1685_v33, %v1685_v33 }
 0x36e   : > { %v1825_v16 = vunpack.c.l.bf16 %v1809_v7  ;;  %v1729_v20 = vunpack.c.l.bf16 %v1707_v35 }
 0x370   : > { %1841 = vst [vmem:[%s2726_s17 + $0x58] sm:$0xff] %v1825_v16  ;;  %v1746_v17 = vadd.f32 %v2720_v57, %v1729_v20 }
 0x372   : > { %v1794_v18 = vmax.f32 %v1746_v17, 0.0 }
 0x373   : > { %v1687_v52 = vpop.f32.mrf.mxu0 }
 0x374   : > { %v1810_v36 = vpack.c.bf16 %v1794_v18, %v1794_v18  ;;  %v1708_v21 = vpack.c.bf16 %v1687_v52, %v1687_v52 }
 0x376   : > { %v1826_v22 = vunpack.c.l.bf16 %v1810_v36  ;;  %v1730_v24 = vunpack.c.l.bf16 %v1708_v21 }
 0x378   : > { %1842 = vst [vmem:[%s2726_s17 + $0x60] sm:$0xff] %v1826_v22  ;;  %v1747_v25 = vadd.f32 %v2720_v57, %v1730_v24 }
 0x37a   : > { %v1795_v8 = vmax.f32 %v1747_v25, 0.0 }
 0x37b   : > { %v1690_v53 = vpop.f32.mrf.mxu0 }
 0x37c   : > { %v1811_v29 = vpack.c.bf16 %v1795_v8, %v1795_v8  ;;  %v1709_v38 = vpack.c.bf16 %v1690_v53, %v1690_v53 }
 0x37e   : > { %v1827_v42 = vunpack.c.l.bf16 %v1811_v29  ;;  %v1731_v39 = vunpack.c.l.bf16 %v1709_v38 }
 0x380   : > { %1843 = vst [vmem:[%s2726_s17 + $0x68] sm:$0xff] %v1827_v42  ;;  %v1748_v0 = vadd.f32 %v2720_v57, %v1731_v39 }
 0x382   : > { %v1796_v12 = vmax.f32 %v1748_v0, 0.0 }
 0x383   : > { %v1692_v61 = vpop.f32.mrf.mxu0 }
 0x384   : > { %v1812_v34 = vpack.c.bf16 %v1796_v12, %v1796_v12  ;;  %v1710_v37 = vpack.c.bf16 %v1692_v61, %v1692_v61 }
 0x386   : > { %v1828_v43 = vunpack.c.l.bf16 %v1812_v34  ;;  %v1732_v41 = vunpack.c.l.bf16 %v1710_v37 }
 0x388   : > { %1844 = vst [vmem:[%s2726_s17 + $0x70] sm:$0xff] %v1828_v43  ;;  %v1749_v40 = vadd.f32 %v2720_v57, %v1732_v41 }
 0x38a   : > { %v1797_v47 = vmax.f32 %v1749_v40, 0.0 }
 0x38c   : > { %v1813_v48 = vpack.c.bf16 %v1797_v47, %v1797_v47 }
 0x38e   : > { %v1829_v49 = vunpack.c.l.bf16 %v1813_v48 }
 0x390   : > { %1845 = vst [vmem:[%s2726_s17 + $0x78] sm:$0xff] %v1829_v49 }
 0x391   : > { %2289 = shalt.err (!%p2286_p8)
}
 0x392   : > { %s2333_s15 = smov 128   ;;  %s2334_s16 = smov 8  }
 0x393   : > { %2182 = dma.vmem_to_hbm [thread:$0]  (%p2403_p5), %s1860_s6, 2048, %s1862_s7, %s1847_s22, %s2333_s15, %s2333_s15, %s2334_s16  }
 0x394 PF: > { %p2194_p9 = scmp.ge.s32.totalorder %s2328_s21, 2  ;;  %s1876_s17 = sand.u32 1, %s2316_s18  }
 0x395   : > { %s1877_s23 = scalar_lea.sflag [#allocation4], %s1876_s17 }
 0x396   : > { %p2189_p10 = pnand %p2194_p9, %p2407_p6 }
 0x398   : > { %p2190_p11 = pneg %p2189_p10 }
 0x39a   : > { %2311 = dma.done.wait (%p2190_p11), %s1877_s23, 2048  }
 0x39b   : > { %2313 = vsyncadd (%p2190_p11), %s1877_s23, 4294965248  ;;  %p16_p12 = scmp.ge.s32.totalorder %s2390_s24, 4   ;;  %s2801_s18 = smov %s2320_s19 }
 0x39c   : > { %s2802_s19 = smov %s2324_s20  ;;  %s2803_s20 = smov %s2401_s27 }
 0x39d   : > { %s2804_s21 = smov %s2390_s24  ;;  %18 = sbr.rel (!%p16_p12) target bundleno = 4 (0x4), region = 86 }
 0x3a2   :  { %1883 = vsyncpa [#allocation3], 1 }
 0x3a3   :  { %1885 = vsyncpa [#allocation3 + $0x1], 1 }
 0x3a4   :  { %1886 = vsyncpa [#allocation4], 1 }
 0x3a5   :  { %1888 = vsyncpa [#allocation4 + $0x1], 1 }

</bundles_post_ra>
